<compile_context>
chip_gen: v7x
topology: tpu7x:2x2x1
jax: 0.10.0
libtpu: 0.0.40
codegen_flags: <defaults>
</compile_context>

<pallas_src>
import functools

import jax
import jax.numpy as jnp
from jax import lax
from jax.experimental import pallas as pl
from jax.experimental.pallas import tpu as pltpu


def _round_up(x, m):
    return ((x + m - 1) // m) * m


def pfn_kernel(xt_ref, w_ref, b_ref, o_ref):
    """xt: (Cin, Tn*P) bf16 (voxel*point axis on lanes);
    w:  (Cin, Cout) bf16, BN scale folded;
    b:  (1, Cout) f32 BN bias;
    o:  (Tn, Cout) f32."""
    tn, cout = o_ref.shape
    cin, tnp = xt_ref.shape
    p = tnp // tn

    # y[r, c] = sum_k xt[k, r] * w[k, c]  — contract the sublane (cin) dim of
    # both operands; the lane-dense LHS is fed to the MXU transposed (same
    # pattern as splash-attention's dkv dot), accumulate in f32.
    y = lax.dot_general(
        xt_ref[...], w_ref[...],
        dimension_numbers=(((0,), (0,)), ((), ())),
        preferred_element_type=jnp.float32)              # (Tn*P, Cout) f32

    # Leading-dim split only (P=32 is a sublane multiple) -> layout-free; then
    # max over the point axis.  Doing the max BEFORE bias+ReLU is exact: the
    # bias is constant over points and ReLU is monotone per channel.
    m = jnp.max(y.reshape(tn, p, cout), axis=1)          # (Tn, Cout)
    o_ref[...] = jnp.maximum(m + b_ref[...], 0.0)


@functools.partial(jax.jit, static_argnames=("tile_n",))
def pfn_layer4_point(inputs, params, *, tile_n=256):
    n, p, cin = inputs.shape
    cout = params["w_lin"].shape[1]

    # ---- fold BatchNorm1d (eval, eps=1e-3) into the linear weight ------------
    eps = 1e-3
    bn_scale = params["bn_gamma"] * lax.rsqrt(params["bn_var"] + eps)
    bn_bias = (params["bn_beta"] - params["bn_mean"] * bn_scale).reshape(1, cout)
    w_eff = (params["w_lin"] * bn_scale[None, :]).astype(jnp.bfloat16)  # (Cin, Cout)

    # ---- lane-dense transposed input: (Cin, n*P), voxel*point axis on lanes --
    # Single fused XLA pass: read f32 (n,P,Cin), write bf16 (Cin, n*P).
    xt = inputs.astype(jnp.bfloat16).reshape(n * p, cin).T

    # ---- voxel tiling: multiple of 8 (so Tn*P is a lane multiple); the last
    # grid step is a ragged block (no wrapper-side padding of the input).
    if n >= 8:
        t = max(8, (min(int(tile_n), n) // 8) * 8)
    else:
        t = n                      # tiny-n fallback: one full-extent block
    steps = pl.cdiv(n, t)

    # ---- scoped-VMEM budget from the actual block footprint ------------------
    cin_pad = _round_up(cin, 16)          # bf16 sublane packing of the K dim
    cl = _round_up(cout, 128)             # physical lane padding
    tnp = t * p
    block_bytes = (2 * cin_pad * tnp * 2          # X^T double buffer (bf16)
                   + 2 * cin_pad * cl * 2         # weight (bf16)
                   + 2 * 8 * cl * 4               # bias
                   + tnp * cl * 4                 # matmul intermediate (f32)
                   + 3 * t * cl * 4               # point-max temporaries
                   + 2 * t * cl * 4)              # output double buffer (f32)
    try:
        cap = int(getattr(pltpu.get_tpu_info(),
                          "vmem_capacity_bytes", 64 << 20)) * 3 // 4
    except Exception:
        cap = 48 << 20                            # safe on v5e/v6e/v7x
    vmem_limit = int(min(cap, max(2 * block_bytes + (2 << 20), 16 << 20)))

    x_max = pl.pallas_call(
        pfn_kernel,
        out_shape=jax.ShapeDtypeStruct((n, cout), jnp.float32),
        grid_spec=pltpu.PrefetchScalarGridSpec(
            num_scalar_prefetch=0,
            grid=(steps,),
            in_specs=[
                pl.BlockSpec((cin, t * p), lambda i: (0, i)),   # X^T (lane-dense)
                pl.BlockSpec((cin, cout), lambda i: (0, 0)),    # BN-folded weight
                pl.BlockSpec((1, cout), lambda i: (0, 0)),      # BN bias
            ],
            out_specs=pl.BlockSpec((t, cout), lambda i: (i, 0)),
        ),
        compiler_params=pltpu.CompilerParams(
            dimension_semantics=("parallel",),
            vmem_limit_bytes=vmem_limit),
    )(xt, w_eff, bn_bias)

    # torch.max(x, dim=1, keepdim=True)[0] -> [n_voxels, 1, out_channels]
    # (unit-dim reshape only: free, no slice / no copy)
    return x_max.reshape(n, 1, cout)


def ref_forward(inputs, params):
    """Pure-JAX f32 reference of the PyTorch forward (returned value only)."""
    eps = 1e-3
    y = inputs @ params["w_lin"]
    y = (y - params["bn_mean"]) / jnp.sqrt(params["bn_var"] + eps)
    y = y * params["bn_gamma"] + params["bn_beta"]
    y = jnp.maximum(y, 0.0)
    return jnp.max(y, axis=1, keepdims=True)


def make_params(key, in_channels, out_channels):
    ks = jax.random.split(key, 5)
    return {
        # nn.Linear(in_channels, out_channels, bias=False), stored as W^T
        "w_lin": 0.1 * jax.random.normal(ks[0], (in_channels, out_channels),
                                         jnp.float32),
        # BatchNorm1d(out_channels) params / running stats (eval mode)
        "bn_gamma": 1.0 + 0.1 * jax.random.normal(ks[1], (out_channels,),
                                                  jnp.float32),
        "bn_beta": 0.1 * jax.random.normal(ks[2], (out_channels,), jnp.float32),
        "bn_mean": 0.1 * jax.random.normal(ks[3], (out_channels,), jnp.float32),
        "bn_var": jnp.abs(jax.random.normal(ks[4], (out_channels,),
                                            jnp.float32)) + 0.5,
        # NOTE: PCAttention parameters intentionally absent — that branch is
        # dead code in the original forward and does not affect the output.
    }


if __name__ == "__main__":
    key = jax.random.PRNGKey(0)
    k_x, k_p = jax.random.split(key)

    # Small shapes consistent with the module: n_points=32 (PCAttention(32)),
    # n_voxels deliberately NOT a multiple of the tile (exercises ragged blocks).
    n_voxels, n_points, in_channels, out_channels = 50, 32, 10, 64
    inputs = jax.random.normal(k_x, (n_voxels, n_points, in_channels),
                               jnp.float32)
    params = make_params(k_p, in_channels, out_channels)
    ref = ref_forward(inputs, params)

    # Default path: tile clamps to 48 -> 2 grid steps, ragged last block.
    out = jax.block_until_ready(pfn_layer4_point(inputs, params))
    assert out.shape == (n_voxels, 1, out_channels)
    # bf16 inputs/weights vs f32 PyTorch reference -> ~1e-3 relative error.
    assert jnp.allclose(out, ref, atol=2e-2, rtol=2e-2), "mismatch (default)"

    # Small-tile path: multi-step pipelined grid (4 steps) + ragged last block.
    out2 = jax.block_until_ready(pfn_layer4_point(inputs, params, tile_n=16))
    assert out2.shape == (n_voxels, 1, out_channels)
    assert jnp.allclose(out2, ref, atol=2e-2, rtol=2e-2), "mismatch (tiled)"

    print("KERNEL_OK")
</pallas_src>

<mosaic_0001>
module attributes {stable_mosaic.version = 11 : i64} {
  func.func @pfn_kernel(%arg0: i32, %arg1: memref<10x1536xbf16, #tpu.memory_space<vmem>>, %arg2: memref<10x64xbf16, #tpu.memory_space<vmem>>, %arg3: memref<1x64xf32, #tpu.memory_space<vmem>>, %arg4: memref<48x64xf32, #tpu.memory_space<vmem>>) attributes {dimension_semantics = [#tpu.dimension_semantics<parallel>], iteration_bounds = array<i64: 2>, scalar_prefetch = 0 : i64, scratch_operands = 0 : i64, tpu.core_type = #tpu.core_type<tc>, window_params = [{transform_indices = @transform_0, window_bounds = array<i64: 10, 1536>}, {pipeline_mode = #tpu.pipeline_mode<synchronous>, transform_indices = @transform_1, window_bounds = array<i64: 10, 64>}, {pipeline_mode = #tpu.pipeline_mode<synchronous>, transform_indices = @transform_2, window_bounds = array<i64: 1, 64>}, {transform_indices = @transform_3, window_bounds = array<i64: 48, 64>}]} {
    %c0 = arith.constant 0 : index
    %c0_0 = arith.constant 0 : index
    %0 = vector.load %arg1[%c0, %c0_0] : memref<10x1536xbf16, #tpu.memory_space<vmem>>, vector<10x1536xbf16>
    %c0_1 = arith.constant 0 : index
    %c0_2 = arith.constant 0 : index
    %1 = vector.load %arg2[%c0_1, %c0_2] : memref<10x64xbf16, #tpu.memory_space<vmem>>, vector<10x64xbf16>
    %cst = arith.constant dense<0.000000e+00> : vector<1536x64xf32>
    %2 = tpu.matmul %0, %1, %cst {dimension_numbers = #tpu.dot_dimension_numbers<[0], [0], [1], [1], [0, 1, 1, 1], [], []>} : vector<10x1536xbf16>, vector<10x64xbf16>, vector<1536x64xf32> -> vector<1536x64xf32>
    %3 = vector.shape_cast %2 : vector<1536x64xf32> to vector<48x32x64xf32>
    %cst_3 = arith.constant dense<0xFF800000> : vector<48x64xf32>
    %4 = vector.multi_reduction <maximumf>, %3, %cst_3 [1] : vector<48x32x64xf32> to vector<48x64xf32>
    %c0_4 = arith.constant 0 : index
    %c0_5 = arith.constant 0 : index
    %5 = vector.load %arg3[%c0_4, %c0_5] : memref<1x64xf32, #tpu.memory_space<vmem>>, vector<1x64xf32>
    %6 = vector.broadcast %5 : vector<1x64xf32> to vector<48x64xf32>
    %7 = arith.addf %4, %6 : vector<48x64xf32>
    %cst_6 = arith.constant 0.000000e+00 : f32
    %8 = vector.broadcast %cst_6 : f32 to vector<48x64xf32>
    %9 = arith.maximumf %7, %8 : vector<48x64xf32>
    %c0_7 = arith.constant 0 : index
    %c0_8 = arith.constant 0 : index
    %10 = vector.load %arg4[%c0_7, %c0_8] : memref<48x64xf32, #tpu.memory_space<vmem>>, vector<48x64xf32>
    tpu.vector_store %arg4[%c0_7, %c0_8], %9 {strides = array<i32>} : memref<48x64xf32, #tpu.memory_space<vmem>>, vector<48x64xf32>,
    return
  }
  func.func @transform_0(%arg0: i32) -> (i32, i32) {
    %c0_i32 = arith.constant 0 : i32
    %c0_i32_0 = arith.constant 0 : i32
    return %c0_i32, %arg0 : i32, i32
  }
  func.func @transform_1(%arg0: i32) -> (i32, i32) {
    %c0_i32 = arith.constant 0 : i32
    %c0_i32_0 = arith.constant 0 : i32
    %c0_i32_1 = arith.constant 0 : i32
    return %c0_i32, %c0_i32_0 : i32, i32
  }
  func.func @transform_2(%arg0: i32) -> (i32, i32) {
    %c0_i32 = arith.constant 0 : i32
    %c0_i32_0 = arith.constant 0 : i32
    %c0_i32_1 = arith.constant 0 : i32
    return %c0_i32, %c0_i32_0 : i32, i32
  }
  func.func @transform_3(%arg0: i32) -> (i32, i32) {
    %c0_i32 = arith.constant 0 : i32
    %c0_i32_0 = arith.constant 0 : i32
    return %arg0, %c0_i32 : i32, i32
  }
}

</mosaic_0001>

<bundles_post_ra>
// kernel: pfn_layer4_point.1
= control target key start
LH: loop header
LB: loop body
LE: loop exit
PB: predicated region body
PF: predicated region fallthrough
CT: control target
= control target key end

     0   :  { %s4099_s12 = smov 0   ;;  %s4101_s13 = smov 0   ;;  %s4966_s0 = inlined_call_operand.vmem [shape: bf16[10,1600], index: 0, kind: input, shape index: {}]   ;;  %s4967_s1 = inlined_call_operand.vmem [shape: bf16[10,64], index: 1, kind: input, shape index: {}]   ;;  %s4968_s2 = inlined_call_operand.vmem [shape: f32[1,64], index: 2, kind: input, shape index: {}]   ;;  %s4969_s3 = inlined_call_operand.vmem [shape: f32[50,64], index: 3, kind: output, shape index: {}]  }
   0x1   :  { %s4103_s14 = smov 0  }
   0x2 LB: > { %s4115_s15 = sadd.s32 4294967295, %s3979_s14   ;;  %s4118_s16 = sadd.s32 1, %s3979_s14   ;;  %s3979_s14 = sphi %s4103_s14, %s4986_s14   ;;  %s3975_s13 = sphi %s4101_s13, %s4985_s13   ;;  %s3971_s12 = sphi %s4099_s12, %s4984_s12  }
   0x3   : > { %s17_s17 = ssub.s32 %s3979_s14, %s4118_s16  ;;  %s20_s18 = sadd.s32 1, %s3975_s13 }
   0x4   : > { %p18_p0 = scmp.eq.s32.totalorder %s17_s17, 0  ;;  %p27_p1 = scmp.ne.s32.totalorder %s3975_s13, %s3971_s12 }
   0x5   : > { %p28_p2 = scmp.eq.s32.totalorder %s3979_s14, 0  ;;  %p99_p3 = scmp.eq.s32.totalorder %s4115_s15, 1 }
   0x6   : > { %s4128_s19 = scalar_select %p18_p0, %s3975_s13, %s20_s18  }
   0x7   : > { %p29_p4 = por %p28_p2, %p27_p1  ;;  %p4130_p5 = por %p99_p3, %p27_p1 }
   0x8   : > { %p3164_p6 = scmp.ge.s32.totalorder %s3979_s14, 2 }
   0xa   : > { %127 = sbr.rel (%p3164_p6) target bundleno = 163 (0xa3), region = 24 }
  0x11   : > { %130 = sbr.rel (!%p29_p4) target bundleno = 163 (0xa3), region = 28  ;;  %s132_s21 = sand.u32 (%p29_p4), 1, %s3975_s13  }
  0x12   : > { %s135_s22 = smul.u32 (%p29_p4), 12, %s3979_s14 }
  0x13   : > { %s3614_s23 = smul.u32 (%p29_p4), 96, %s132_s21 }
  0x14   : > { %s136_s24 = ssub.s32 (%p29_p4), 13, %s135_s22  ;;  %s3313_s25 = smul.u32 (%p29_p4), 48, %s3979_s14 }
  0x15   : > { %p137_p7 = scmp.lt.s32.totalorder (%p29_p4), %s136_s24, 12  ;;  %s4145_s4 = scalar_lea.vmem (%p29_p4), [#allocation2], %s3614_s23  }
  0x16   : > { %s4141_s28 = scalar_lea.vmem (%p29_p4), %s4966_s0, %s3313_s25  }
  0x18   : > { %s4988_s24 = smov (!%p137_p7, %s136_s24), 12 }
  0x19   : > { %s3165_s29 = sshll.u32 %s4988_s24, 7  ;;  %s4143_s30 = sshll.u32 %s4988_s24, 2 }
  0x1a   : > { %p3169_p8 = scmp.eq.s32.totalorder %s3165_s29, 0 }
  0x1b   : > { %p147_p9 = scmp.lt.u32.totalorder (!%p3169_p8), %s4143_s30, 8 }
  0x1c   : > { %146 = sbr.rel (%p3169_p8) target bundleno = 163 (0xa3), region = 32 }
  0x23   : > { %150 = sbr.rel (%p147_p9) target bundleno = 154 (0x9a), region = 36  ;;  %s4149_s5 = sand.u32 (!%p147_p9), 7, %s4143_s30  }
  0x24   : > { %p168_p10 = scmp.eq.s32.totalorder (!%p147_p9), %s4149_s5, 0  ;;  %p3170_p11 = scmp.ne.s32.totalorder (!%p147_p9), %s4149_s5, 0 }
  0x2a   : > { %171 = sbr.rel (%p3170_p11) target bundleno = 96 (0x60), region = 51  ;;  %s172_s6 = sshrl.u32 (!%p3170_p11), %s4143_s30, 3 }
  0x2b   : > { %s4156_s7 = sshrl.u32 (!%p3170_p11), %s172_s6, 5 }
  0x2c   : > { %p3171_p12 = scmp.le.s32.totalorder (!%p3170_p11), %s4156_s7, 0 }
  0x31   : > { %3062 = sbr.rel (%p3171_p12) target bundleno = 76 (0x4c), region = 205  ;;  %s4971_s8 = smov (!%p3171_p12), %s4145_s4 }
  0x32   : > { %s4972_s9 = smov (!%p3171_p12), %s4141_s28  ;;  %s4165_s10 = smov (!%p3171_p12), 0  }
  0x33   : > { %s4167_s11 = smov (!%p3171_p12), 0  }
  0x38 LB: >> { %v185_v0 = vld [vmem:[%s3987_s9] sm:$0xff]  ;;  %v187_v1 = vld [vmem:[%s3987_s9 + $0x8] sm:$0xff]  ;;  %v189_v2 = vld [vmem:[%s3987_s9 + $0x10] sm:$0xff]  ;;  %s313_s17 = sadd.s32 1, %s3991_s10  ;;  %s179_s11 = sadd.s32 1, %s3995_s11   ;;  %s3995_s11 = sphi %s4167_s11, %s179_s11   ;;  %s3991_s10 = sphi %s4165_s10, %s4975_s10   ;;  %s3987_s9 = sphi %s4972_s9, %s4974_s9   ;;  %s3983_s8 = sphi %s4971_s8, %s4973_s8  }
  0x39   : >> { %186 = vst [vmem:[%s3983_s8] sm:$0xff] %v185_v0  ;;  %188 = vst [vmem:[%s3983_s8 + $0x8] sm:$0xff] %v187_v1  ;;  %v191_v3 = vld [vmem:[%s3987_s9 + $0x18] sm:$0xff]  ;;  %v193_v4 = vld [vmem:[%s3987_s9 + $0x20] sm:$0xff]  ;;  %p314_p13 = scmp.ge.s32.totalorder %s313_s17, %s4156_s7  ;;  %p178_p0 = scmp.ge.s32.totalorder %s179_s11, %s4156_s7 }
  0x3a   : >> { %190 = vst [vmem:[%s3983_s8 + $0x10] sm:$0xff] %v189_v2  ;;  %v195_v5 = vld [vmem:[%s3987_s9 + $0x28] sm:$0xff]  ;;  %192 = vst [vmem:[%s3983_s8 + $0x18] sm:$0xff] %v191_v3  ;;  %v249_v6 = vld [vmem:[%s3987_s9 + $0x34] sm:$0xff] }
  0x3b   : >> { %194 = vst [vmem:[%s3983_s8 + $0x20] sm:$0xff] %v193_v4  ;;  %196 = vst [vmem:[%s3983_s8 + $0x28] sm:$0xff] %v195_v5  ;;  %v251_v7 = vld [vmem:[%s3987_s9 + $0x3c] sm:$0xff]  ;;  %v253_v8 = vld [vmem:[%s3987_s9 + $0x44] sm:$0xff]  ;;  %s4990_s17 = smov (%p314_p13, %s313_s17), 0 }
  0x3c   : >> { %250 = vst [vmem:[%s3983_s8 + $0x30] sm:$0xff] %v249_v6  ;;  %252 = vst [vmem:[%s3983_s8 + $0x38] sm:$0xff] %v251_v7  ;;  %v255_v9 = vld [vmem:[%s3987_s9 + $0x4c] sm:$0xff]  ;;  %v257_v10 = vld [vmem:[%s3987_s9 + $0x54] sm:$0xff]  ;;  %s3172_s18 = sshll.u32 %s4990_s17, 8  ;;  %s4975_s10 = smov %s4990_s17 }
  0x3d   : >> { %254 = vst [vmem:[%s3983_s8 + $0x40] sm:$0xff] %v253_v8  ;;  %v259_v11 = vld [vmem:[%s3987_s9 + $0x5c] sm:$0xff]  ;;  %256 = vst [vmem:[%s3983_s8 + $0x48] sm:$0xff] %v255_v9  ;;  %v261_v12 = vld [vmem:[%s3987_s9 + $0x64] sm:$0xff]  ;;  %s4238_s21 = scalar_lea.vmem %s4141_s28, %s3172_s18   ;;  %s319_s22 = scalar_lea.vmem %s4145_s4, %s3172_s18 [#allocation2]  }
  0x3e   : >> { %258 = vst [vmem:[%s3983_s8 + $0x50] sm:$0xff] %v257_v10  ;;  %260 = vst [vmem:[%s3983_s8 + $0x58] sm:$0xff] %v259_v11  ;;  %v263_v13 = vld [vmem:[%s3987_s9 + $0x6c] sm:$0xff]  ;;  %v265_v14 = vld [vmem:[%s3987_s9 + $0x74] sm:$0xff] }
  0x3f   : >> { %262 = vst [vmem:[%s3983_s8 + $0x60] sm:$0xff] %v261_v12  ;;  %264 = vst [vmem:[%s3983_s8 + $0x68] sm:$0xff] %v263_v13  ;;  %v267_v15 = vld [vmem:[%s3987_s9 + $0x7c] sm:$0xff]  ;;  %v269_v16 = vld [vmem:[%s3987_s9 + $0x84] sm:$0xff] }
  0x40   : >> { %266 = vst [vmem:[%s3983_s8 + $0x70] sm:$0xff] %v265_v14  ;;  %v271_v17 = vld [vmem:[%s3987_s9 + $0x8c] sm:$0xff]  ;;  %268 = vst [vmem:[%s3983_s8 + $0x78] sm:$0xff] %v267_v15  ;;  %v273_v18 = vld [vmem:[%s3987_s9 + $0x94] sm:$0xff] }
  0x41   : >> { %270 = vst [vmem:[%s3983_s8 + $0x80] sm:$0xff] %v269_v16  ;;  %272 = vst [vmem:[%s3983_s8 + $0x88] sm:$0xff] %v271_v17  ;;  %v275_v19 = vld [vmem:[%s3987_s9 + $0x9c] sm:$0xff]  ;;  %v277_v20 = vld [vmem:[%s3987_s9 + $0xa4] sm:$0xff] }
  0x42   : >> { %274 = vst [vmem:[%s3983_s8 + $0x90] sm:$0xff] %v273_v18  ;;  %276 = vst [vmem:[%s3983_s8 + $0x98] sm:$0xff] %v275_v19  ;;  %v279_v21 = vld [vmem:[%s3987_s9 + $0xac] sm:$0xff]  ;;  %v281_v22 = vld [vmem:[%s3987_s9 + $0xb4] sm:$0xff] }
  0x43   : >> { %278 = vst [vmem:[%s3983_s8 + $0xa0] sm:$0xff] %v277_v20  ;;  %v283_v23 = vld [vmem:[%s3987_s9 + $0xbc] sm:$0xff]  ;;  %280 = vst [vmem:[%s3983_s8 + $0xa8] sm:$0xff] %v279_v21  ;;  %v285_v24 = vld [vmem:[%s3987_s9 + $0xc4] sm:$0xff] }
  0x44   : >> { %282 = vst [vmem:[%s3983_s8 + $0xb0] sm:$0xff] %v281_v22  ;;  %284 = vst [vmem:[%s3983_s8 + $0xb8] sm:$0xff] %v283_v23  ;;  %v287_v25 = vld [vmem:[%s3987_s9 + $0xcc] sm:$0xff]  ;;  %v289_v26 = vld [vmem:[%s3987_s9 + $0xd4] sm:$0xff] }
  0x45   : >> { %286 = vst [vmem:[%s3983_s8 + $0xc0] sm:$0xff] %v285_v24  ;;  %288 = vst [vmem:[%s3983_s8 + $0xc8] sm:$0xff] %v287_v25  ;;  %v291_v27 = vld [vmem:[%s3987_s9 + $0xdc] sm:$0xff]  ;;  %v293_v28 = vld [vmem:[%s3987_s9 + $0xe4] sm:$0xff]  ;;  %181 = sbr.rel (!%p178_p0) target bundleno = 56 (0x38), region = 211 }
  0x46   : >> { %290 = vst [vmem:[%s3983_s8 + $0xd0] sm:$0xff] %v289_v26  ;;  %v295_v29 = vld [vmem:[%s3987_s9 + $0xec] sm:$0xff]  ;;  %292 = vst [vmem:[%s3983_s8 + $0xd8] sm:$0xff] %v291_v27  ;;  %v297_v30 = vld [vmem:[%s3987_s9 + $0xf4] sm:$0xff] }
  0x47   : >> { %294 = vst [vmem:[%s3983_s8 + $0xe0] sm:$0xff] %v293_v28  ;;  %296 = vst [vmem:[%s3983_s8 + $0xe8] sm:$0xff] %v295_v29  ;;  %v299_v31 = vld [vmem:[%s3987_s9 + $0xfc] sm:$0xff]  ;;  %v301_v32 = vld [vmem:[%s3987_s9 + $0x104] sm:$0xff] }
  0x48   : >> { %298 = vst [vmem:[%s3983_s8 + $0xf0] sm:$0xff] %v297_v30  ;;  %300 = vst [vmem:[%s3983_s8 + $0xf8] sm:$0xff] %v299_v31  ;;  %v303_v33 = vld [vmem:[%s3987_s9 + $0x10c] sm:$0xff]  ;;  %v305_v34 = vld [vmem:[%s3987_s9 + $0x114] sm:$0xff] }
  0x49   : >> { %302 = vst [vmem:[%s3983_s8 + $0x100] sm:$0xff] %v301_v32  ;;  %v307_v35 = vld [vmem:[%s3987_s9 + $0x11c] sm:$0xff]  ;;  %304 = vst [vmem:[%s3983_s8 + $0x108] sm:$0xff] %v303_v33  ;;  %v309_v36 = vld [vmem:[%s3987_s9 + $0x124] sm:$0xff] }
  0x4a   : >> { %306 = vst [vmem:[%s3983_s8 + $0x110] sm:$0xff] %v305_v34  ;;  %308 = vst [vmem:[%s3983_s8 + $0x118] sm:$0xff] %v307_v35  ;;  %v311_v37 = vld [vmem:[%s3987_s9 + $0x12c] sm:$0xff]  ;;  %s4974_s9 = smov %s4238_s21 }
  0x4b   : >> { %310 = vst [vmem:[%s3983_s8 + $0x120] sm:$0xff] %v309_v36  ;;  %312 = vst [vmem:[%s3983_s8 + $0x128] sm:$0xff] %v311_v37  ;;  %s4973_s8 = smov %s319_s22 }
  0x4c PF: > { %s4280_s23 = sand.u32 31, %s172_s6   ;;  %s3314_s24 = sshll.u32 %s4156_s7, 12 }
  0x4d   : > { %s324_s25 = sshra.s32 %s3314_s24, 4  ;;  %p3177_p1 = scmp.le.s32.totalorder %s4280_s23, 0 }
  0x4e   : > { %s4284_s26 = scalar_lea.vmem %s4141_s28, %s324_s25   ;;  %s328_s27 = scalar_lea.vmem %s4145_s4, %s324_s25 [#allocation2]  }
  0x4f   : > { %3076 = sbr.rel (%p3177_p1) target bundleno = 96 (0x60), region = 216  ;;  %s3997_s29 = smov (!%p3177_p1), %s328_s27  }
  0x50   : > { %s4001_s11 = smov (!%p3177_p1), %s4284_s26   ;;  %s4005_s17 = smov (!%p3177_p1), 0  }
  0x51   : > { %s4009_s8 = smov (!%p3177_p1), 0  }
  0x56 LB: >> { %v340_v38 = vld [vmem:[%s4003_s11] sm:$0xff]  ;;  %v342_v39 = vld [vmem:[%s4003_s11 + $0x34] sm:$0xff]  ;;  %s344_s6 = sadd.s32 1, %s4007_s17  ;;  %s334_s8 = sadd.s32 1, %s4011_s8   ;;  %s4011_s8 = sphi %s4009_s8, %s334_s8   ;;  %s4007_s17 = sphi %s4005_s17, %s4006_s17   ;;  %s4003_s11 = sphi %s4001_s11, %s349_s11   ;;  %s3999_s29 = sphi %s3997_s29, %s350_s29  }
  0x57   : >> { %341 = vst [vmem:[%s3999_s29] sm:$0xff] %v340_v38  ;;  %343 = vst [vmem:[%s3999_s29 + $0x30] sm:$0xff] %v342_v39  ;;  %p345_p2 = scmp.ge.s32.totalorder %s344_s6, %s4280_s23  ;;  %p333_p3 = scmp.ge.s32.totalorder %s334_s8, %s4280_s23 }
  0x59   : >> { %s4992_s6 = smov (%p345_p2, %s344_s6), 0  ;;  %336 = sbr.rel (!%p333_p3) target bundleno = 86 (0x56), region = 222 }
  0x5a   : >> { %s3178_s7 = sshll.u32 %s4992_s6, 3  ;;  %s4006_s17 = smov %s4992_s6  }
  0x5b   : >> { %s349_s11 = scalar_lea.vmem %s4284_s26, %s3178_s7   ;;  %s350_s29 = scalar_lea.vmem %s328_s27, %s3178_s7 [#allocation2]  }
  0x60 PF: > { %353 = sbr.rel (%p168_p10) target bundleno = 154 (0x9a), region = 69  ;;  %s355_s9 = ssub.s32 (!%p168_p10), %s4143_s30, %s4149_s5 }
  0x61   : > { %s359_s10 = sshrl.u32 (!%p168_p10), %s4143_s30, 3  ;;  %s4298_s18 = scalar_lea.vmem (!%p168_p10), %s4141_s28, %s355_s9 }
  0x62   : > { %s4301_s21 = scalar_lea.vmem (!%p168_p10), %s4145_s4, %s355_s9 [#allocation2]  ;;  %s4305_s22 = sshrl.u32 (!%p168_p10), %s359_s10, 5 }
  0x63   : > { %p3180_p4 = scmp.le.s32.totalorder (!%p168_p10), %s4305_s22, 0 }
  0x67   : > { %3090 = sbr.rel (%p3180_p4) target bundleno = 130 (0x82), region = 227  ;;  %s4976_s23 = smov (!%p3180_p4), %s4145_s4 }
  0x68   : > { %s4977_s24 = smov (!%p3180_p4), %s4141_s28  ;;  %s4314_s25 = smov (!%p3180_p4), 0  }
  0x69   : > { %s4316_s26 = smov (!%p3180_p4), 0  }
  0x6e LB: >> { %v372_v40 = vld [vmem:[%s4019_s24] sm:$0xff]  ;;  %v374_v41 = vld [vmem:[%s4019_s24 + $0x8] sm:$0xff]  ;;  %v376_v42 = vld [vmem:[%s4019_s24 + $0x10] sm:$0xff]  ;;  %s500_s27 = sadd.s32 1, %s4023_s25  ;;  %s366_s26 = sadd.s32 1, %s4027_s26   ;;  %s4027_s26 = sphi %s4316_s26, %s366_s26   ;;  %s4023_s25 = sphi %s4314_s25, %s4980_s25   ;;  %s4019_s24 = sphi %s4977_s24, %s4979_s24   ;;  %s4015_s23 = sphi %s4976_s23, %s4978_s23  }
  0x6f   : >> { %373 = vst [vmem:[%s4015_s23] sm:$0xff] %v372_v40  ;;  %375 = vst [vmem:[%s4015_s23 + $0x8] sm:$0xff] %v374_v41  ;;  %v378_v43 = vld [vmem:[%s4019_s24 + $0x18] sm:$0xff]  ;;  %v380_v44 = vld [vmem:[%s4019_s24 + $0x20] sm:$0xff]  ;;  %p501_p6 = scmp.ge.s32.totalorder %s500_s27, %s4305_s22  ;;  %p365_p7 = scmp.ge.s32.totalorder %s366_s26, %s4305_s22 }
  0x70   : >> { %377 = vst [vmem:[%s4015_s23 + $0x10] sm:$0xff] %v376_v42  ;;  %v382_v45 = vld [vmem:[%s4019_s24 + $0x28] sm:$0xff]  ;;  %379 = vst [vmem:[%s4015_s23 + $0x18] sm:$0xff] %v378_v43  ;;  %v436_v46 = vld [vmem:[%s4019_s24 + $0x34] sm:$0xff] }
  0x71   : >> { %381 = vst [vmem:[%s4015_s23 + $0x20] sm:$0xff] %v380_v44  ;;  %383 = vst [vmem:[%s4015_s23 + $0x28] sm:$0xff] %v382_v45  ;;  %v438_v47 = vld [vmem:[%s4019_s24 + $0x3c] sm:$0xff]  ;;  %v440_v48 = vld [vmem:[%s4019_s24 + $0x44] sm:$0xff]  ;;  %s4994_s27 = smov (%p501_p6, %s500_s27), 0 }
  0x72   : >> { %437 = vst [vmem:[%s4015_s23 + $0x30] sm:$0xff] %v436_v46  ;;  %439 = vst [vmem:[%s4015_s23 + $0x38] sm:$0xff] %v438_v47  ;;  %v442_v49 = vld [vmem:[%s4019_s24 + $0x4c] sm:$0xff]  ;;  %v444_v50 = vld [vmem:[%s4019_s24 + $0x54] sm:$0xff]  ;;  %s3181_s29 = sshll.u32 %s4994_s27, 8  ;;  %s4980_s25 = smov %s4994_s27 }
  0x73   : >> { %441 = vst [vmem:[%s4015_s23 + $0x40] sm:$0xff] %v440_v48  ;;  %v446_v51 = vld [vmem:[%s4019_s24 + $0x5c] sm:$0xff]  ;;  %443 = vst [vmem:[%s4015_s23 + $0x48] sm:$0xff] %v442_v49  ;;  %v448_v52 = vld [vmem:[%s4019_s24 + $0x64] sm:$0xff]  ;;  %s4387_s11 = scalar_lea.vmem %s4141_s28, %s3181_s29   ;;  %s506_s17 = scalar_lea.vmem %s4145_s4, %s3181_s29 [#allocation2]  }
  0x74   : >> { %445 = vst [vmem:[%s4015_s23 + $0x50] sm:$0xff] %v444_v50  ;;  %447 = vst [vmem:[%s4015_s23 + $0x58] sm:$0xff] %v446_v51  ;;  %v450_v53 = vld [vmem:[%s4019_s24 + $0x6c] sm:$0xff]  ;;  %v452_v54 = vld [vmem:[%s4019_s24 + $0x74] sm:$0xff] }
  0x75   : >> { %449 = vst [vmem:[%s4015_s23 + $0x60] sm:$0xff] %v448_v52  ;;  %451 = vst [vmem:[%s4015_s23 + $0x68] sm:$0xff] %v450_v53  ;;  %v454_v55 = vld [vmem:[%s4019_s24 + $0x7c] sm:$0xff]  ;;  %v456_v56 = vld [vmem:[%s4019_s24 + $0x84] sm:$0xff] }
  0x76   : >> { %453 = vst [vmem:[%s4015_s23 + $0x70] sm:$0xff] %v452_v54  ;;  %v458_v57 = vld [vmem:[%s4019_s24 + $0x8c] sm:$0xff]  ;;  %455 = vst [vmem:[%s4015_s23 + $0x78] sm:$0xff] %v454_v55  ;;  %v460_v58 = vld [vmem:[%s4019_s24 + $0x94] sm:$0xff] }
  0x77   : >> { %457 = vst [vmem:[%s4015_s23 + $0x80] sm:$0xff] %v456_v56  ;;  %459 = vst [vmem:[%s4015_s23 + $0x88] sm:$0xff] %v458_v57  ;;  %v462_v59 = vld [vmem:[%s4019_s24 + $0x9c] sm:$0xff]  ;;  %v464_v60 = vld [vmem:[%s4019_s24 + $0xa4] sm:$0xff] }
  0x78   : >> { %461 = vst [vmem:[%s4015_s23 + $0x90] sm:$0xff] %v460_v58  ;;  %463 = vst [vmem:[%s4015_s23 + $0x98] sm:$0xff] %v462_v59  ;;  %v466_v61 = vld [vmem:[%s4019_s24 + $0xac] sm:$0xff]  ;;  %v468_v62 = vld [vmem:[%s4019_s24 + $0xb4] sm:$0xff] }
  0x79   : >> { %465 = vst [vmem:[%s4015_s23 + $0xa0] sm:$0xff] %v464_v60  ;;  %v470_v63 = vld [vmem:[%s4019_s24 + $0xbc] sm:$0xff]  ;;  %467 = vst [vmem:[%s4015_s23 + $0xa8] sm:$0xff] %v466_v61  ;;  %v472_v0 = vld [vmem:[%s4019_s24 + $0xc4] sm:$0xff] }
  0x7a   : >> { %469 = vst [vmem:[%s4015_s23 + $0xb0] sm:$0xff] %v468_v62  ;;  %471 = vst [vmem:[%s4015_s23 + $0xb8] sm:$0xff] %v470_v63  ;;  %v474_v1 = vld [vmem:[%s4019_s24 + $0xcc] sm:$0xff]  ;;  %v476_v2 = vld [vmem:[%s4019_s24 + $0xd4] sm:$0xff] }
  0x7b   : >> { %473 = vst [vmem:[%s4015_s23 + $0xc0] sm:$0xff] %v472_v0  ;;  %475 = vst [vmem:[%s4015_s23 + $0xc8] sm:$0xff] %v474_v1  ;;  %v478_v3 = vld [vmem:[%s4019_s24 + $0xdc] sm:$0xff]  ;;  %v480_v4 = vld [vmem:[%s4019_s24 + $0xe4] sm:$0xff]  ;;  %368 = sbr.rel (!%p365_p7) target bundleno = 110 (0x6e), region = 233 }
  0x7c   : >> { %477 = vst [vmem:[%s4015_s23 + $0xd0] sm:$0xff] %v476_v2  ;;  %v482_v5 = vld [vmem:[%s4019_s24 + $0xec] sm:$0xff]  ;;  %479 = vst [vmem:[%s4015_s23 + $0xd8] sm:$0xff] %v478_v3  ;;  %v484_v6 = vld [vmem:[%s4019_s24 + $0xf4] sm:$0xff] }
  0x7d   : >> { %481 = vst [vmem:[%s4015_s23 + $0xe0] sm:$0xff] %v480_v4  ;;  %483 = vst [vmem:[%s4015_s23 + $0xe8] sm:$0xff] %v482_v5  ;;  %v486_v7 = vld [vmem:[%s4019_s24 + $0xfc] sm:$0xff]  ;;  %v488_v8 = vld [vmem:[%s4019_s24 + $0x104] sm:$0xff] }
  0x7e   : >> { %485 = vst [vmem:[%s4015_s23 + $0xf0] sm:$0xff] %v484_v6  ;;  %487 = vst [vmem:[%s4015_s23 + $0xf8] sm:$0xff] %v486_v7  ;;  %v490_v9 = vld [vmem:[%s4019_s24 + $0x10c] sm:$0xff]  ;;  %v492_v10 = vld [vmem:[%s4019_s24 + $0x114] sm:$0xff] }
  0x7f   : >> { %489 = vst [vmem:[%s4015_s23 + $0x100] sm:$0xff] %v488_v8  ;;  %v494_v11 = vld [vmem:[%s4019_s24 + $0x11c] sm:$0xff]  ;;  %491 = vst [vmem:[%s4015_s23 + $0x108] sm:$0xff] %v490_v9  ;;  %v496_v12 = vld [vmem:[%s4019_s24 + $0x124] sm:$0xff] }
  0x80   : >> { %493 = vst [vmem:[%s4015_s23 + $0x110] sm:$0xff] %v492_v10  ;;  %495 = vst [vmem:[%s4015_s23 + $0x118] sm:$0xff] %v494_v11  ;;  %v498_v13 = vld [vmem:[%s4019_s24 + $0x12c] sm:$0xff]  ;;  %s4979_s24 = smov %s4387_s11 }
  0x81   : >> { %497 = vst [vmem:[%s4015_s23 + $0x120] sm:$0xff] %v496_v12  ;;  %499 = vst [vmem:[%s4015_s23 + $0x128] sm:$0xff] %v498_v13  ;;  %s4978_s23 = smov %s506_s17 }
  0x82 PF: > { %s4429_s8 = sand.u32 31, %s359_s10   ;;  %s3316_s6 = sshll.u32 %s4305_s22, 12 }
  0x83   : > { %s511_s7 = sshra.s32 %s3316_s6, 4  ;;  %p3186_p8 = scmp.le.s32.totalorder %s4429_s8, 0 }
  0x84   : > { %s4433_s9 = scalar_lea.vmem %s4141_s28, %s511_s7   ;;  %s515_s29 = scalar_lea.vmem %s4145_s4, %s511_s7 [#allocation2]  }
  0x85   : > { %3104 = sbr.rel (%p3186_p8) target bundleno = 150 (0x96), region = 238  ;;  %s4029_s27 = smov (!%p3186_p8), %s515_s29  }
  0x86   : > { %s4033_s26 = smov (!%p3186_p8), %s4433_s9   ;;  %s4037_s11 = smov (!%p3186_p8), 0  }
  0x87   : > { %s4041_s23 = smov (!%p3186_p8), 0  }
  0x8c LB: >> { %v527_v14 = vld [vmem:[%s4035_s26] sm:$0xff]  ;;  %v529_v15 = vld [vmem:[%s4035_s26 + $0x34] sm:$0xff]  ;;  %s531_s10 = sadd.s32 1, %s4039_s11  ;;  %s521_s23 = sadd.s32 1, %s4043_s23   ;;  %s4043_s23 = sphi %s4041_s23, %s521_s23   ;;  %s4039_s11 = sphi %s4037_s11, %s4038_s11   ;;  %s4035_s26 = sphi %s4033_s26, %s536_s26   ;;  %s4031_s27 = sphi %s4029_s27, %s537_s27  }
  0x8d   : >> { %528 = vst [vmem:[%s4031_s27] sm:$0xff] %v527_v14  ;;  %530 = vst [vmem:[%s4031_s27 + $0x30] sm:$0xff] %v529_v15  ;;  %p532_p9 = scmp.ge.s32.totalorder %s531_s10, %s4429_s8  ;;  %p520_p10 = scmp.ge.s32.totalorder %s521_s23, %s4429_s8 }
  0x8f   : >> { %s4996_s10 = smov (%p532_p9, %s531_s10), 0  ;;  %523 = sbr.rel (!%p520_p10) target bundleno = 140 (0x8c), region = 244 }
  0x90   : >> { %s3187_s22 = sshll.u32 %s4996_s10, 3  ;;  %s4038_s11 = smov %s4996_s10  }
  0x91   : >> { %s536_s26 = scalar_lea.vmem %s4433_s9, %s3187_s22   ;;  %s537_s27 = scalar_lea.vmem %s515_s29, %s3187_s22 [#allocation2]  }
  0x96 PF: > { %s4077_s24 = smov 0  }
  0x97   : > { %s538_s25 = sshllo.u32 %s4077_s24, %s4149_s5 }
  0x98   : > { %v547_v16 = vld [vmem:[%s4298_s18] sm:%s538_s25]  ;;  %v549_v17 = vld [vmem:[%s4298_s18 + $0x34] sm:%s538_s25] }
  0x99   : > { %548 = vst [vmem:[%s4301_s21] sm:%s538_s25] %v547_v16  ;;  %550 = vst [vmem:[%s4301_s21 + $0x30] sm:%s538_s25] %v549_v17 }
  0x9a PF: > { %p3189_p11 = scmp.ge.u32.totalorder %s4143_s30, 8 }
  0x9b   : > { %s4078_s17 = smov (!%p3189_p11), 0  }
  0x9c   : > { %153 = sbr.rel (%p3189_p11) target bundleno = 163 (0xa3), region = 40  ;;  %s154_s8 = sshllo.u32 (!%p3189_p11), %s4078_s17, %s4143_s30 }
  0x9d   : > { %v163_v18 = vld [vmem:[%s4141_s28] sm:%s154_s8] (!%p3189_p11)  ;;  %v165_v19 = vld [vmem:[%s4141_s28 + $0x34] sm:%s154_s8] (!%p3189_p11) }
  0x9e   : > { %164 = vst [vmem:[%s4145_s4] sm:%s154_s8] (!%p3189_p11), %v163_v18  ;;  %166 = vst [vmem:[%s4145_s4 + $0x30] sm:%s154_s8] (!%p3189_p11), %v165_v19 }
  0xa3 PF: > { %p3190_p12 = scmp.ge.s32.totalorder %s3979_s14, 1  ;;  %p553_p13 = scmp.lt.s32.totalorder %s3979_s14, 3 }
  0xa5   : > { %p554_p0 = pnand %p3190_p12, %p553_p13 }
  0xa6   : > { %s560_s5 = sand.u32 (!%p554_p0), 1, %s3971_s12   ;;  %v3848_v20 = vld [vmem:[%s4967_s1] sm:$0x1f] (!%p554_p0)   ;;  %vm1153_vm0 = vcmask (!%p554_p0), 1044480   ;;  %vm864_vm1 = vcmask (!%p554_p0), 80896   ;;  %vm1958_vm2 = vcmask (!%p554_p0), 523264  }
  0xa7   : > { %557 = sbr.rel (%p554_p0) target bundleno = 798 (0x31e), region = 94  ;;  %3612 = vmatprep.subr.msk.bf16.mxu0 (!%p554_p0), %vm1153_vm0, %v3848_v20  ;;  %v1155_v21 = vsel (!%p554_p0), %vm1153_vm0, %v3848_v20, 0  ;;  %3613 = vmatprep.subr.msk.bf16.mxu1 (!%p554_p0), %vm1153_vm0, %v3848_v20  ;;  %vm2735_vm3 = vcmask (!%p554_p0), 1041409   ;;  %vm2738_vm4 = vcmask (!%p554_p0), 1042434   ;;  %vm2741_vm5 = vcmask (!%p554_p0), 1043459  }
  0xa8   : > { %s3615_s18 = smul.u32 (!%p554_p0), 96, %s560_s5  ;;  %3417 = vmatpush3.bf16.msra.mxu0 (!%p554_p0), %v1155_v21  ;;  %3611 = vmatpush3.bf16.msra.mxu1 (!%p554_p0), %v1155_v21  ;;  %vm2744_vm6 = vcmask (!%p554_p0), 1044484   ;;  %vm2747_vm7 = vcmask (!%p554_p0), 1045509   ;;  %vm2750_vm8 = vcmask (!%p554_p0), 1046534   ;;  %vm2753_vm9 = vcmask (!%p554_p0), 1047559  }
  0xa9   : > { %s4660_s6 = smul.u32 (!%p554_p0), 48, %s560_s5 }
  0xaa   : > { %s4460_s28 = scalar_lea.vmem (!%p554_p0), [#allocation2], %s3615_s18 }
  0xab   : > { %v3837_v22 = vld [vmem:[%s4460_s28] ss:$48 sps:$4 sm:$0x1f] (!%p554_p0)   ;;  %v3839_v23 = vld [vmem:[%s4460_s28 + $0x4] ss:$48 sps:$4 sm:$0x1f] (!%p554_p0)  }
  0xac   : > { %667 = vxpose.xlu0.c.b16.start.end [1/1] (short) (!%p554_p0), %v3837_v22, 128  ;;  %683 = vxpose.xlu1.c.b16.start.end [1/1] (short) (!%p554_p0), %v3839_v23, 128  ;;  %v3840_v24 = vld [vmem:[%s4460_s28 + $0x18] ss:$48 sps:$4 sm:$0x1f] (!%p554_p0)   ;;  %v3842_v25 = vld [vmem:[%s4460_s28 + $0x1c] ss:$48 sps:$4 sm:$0x1f] (!%p554_p0)  }
  0xad   : > { %v3843_v26 = vld [vmem:[%s4460_s28 + $0x8] ss:$48 sps:$4 sm:$0x1f] (!%p554_p0)   ;;  %v3845_v27 = vld [vmem:[%s4460_s28 + $0x20] ss:$48 sps:$4 sm:$0x1f] (!%p554_p0)  }
  0xae   : > { %v3847_v28 = vld [vmem:[%s4460_s28 + $0xc] ss:$48 sps:$4 sm:$0x1f]   ;;  %v3849_v29 = vld [vmem:[%s4460_s28 + $0x24] ss:$48 sps:$4 sm:$0x1f]  }
  0xaf   : > { %v3850_v36 = vld [vmem:[%s4460_s28 + $0x10] ss:$48 sps:$4 sm:$0x1f]   ;;  %v3852_v37 = vld [vmem:[%s4460_s28 + $0x28] ss:$48 sps:$4 sm:$0x1f]  }
  0xb0   : > { %v3854_v52 = vld [vmem:[%s4460_s28 + $0x14] ss:$48 sps:$4 sm:$0x1f]   ;;  %v3855_v54 = vld [vmem:[%s4460_s28 + $0x2c] ss:$48 sps:$4 sm:$0x1f]  }
  0xb1   : > { %s4674_s12 = scalar_lea.vmem [#allocation3], %s4660_s6   ;;  %s2844_s29 = smul.u32 (%p4130_p5), 6, %s4115_s15 }
  0xb2   : > { %s3318_s27 = smul.u32 (%p4130_p5), 48, %s4115_s15 }
  0xb3   : > { %s2845_s26 = ssub.s32 (%p4130_p5), 7, %s2844_s29 }
  0xb4   : > { %p2846_p1 = scmp.lt.s32.totalorder (%p4130_p5), %s2845_s26, 6  ;;  %s4917_s10 = scalar_lea.vmem (%p4130_p5), %s4969_s3, %s3318_s27  }
  0xc9   : > { %763 = vxpose.xlu0.c.b16.start.end [1/1] (short) %v3840_v24, 128  ;;  %779 = vxpose.xlu1.c.b16.start.end [1/1] (short) %v3842_v25, 128 }
  0xe6   : > { %699 = vxpose.xlu0.c.b16.start.end [1/1] (short) %v3843_v26, 128  ;;  %795 = vxpose.xlu1.c.b16.start.end [1/1] (short) %v3845_v27, 128 }
 0x103   : > { %715 = vxpose.xlu0.c.b16.start.end [1/1] (short) %v3847_v28, 128  ;;  %811 = vxpose.xlu1.c.b16.start.end [1/1] (short) %v3849_v29, 128 }
 0x112   : > { %v675_v30 = vpop.trf.xlu0  ;;  %v691_v31 = vpop.trf.xlu1 }
 0x113   : > { %3418 = vmatprep.mubr.msk.bf16.mxu0 %vm864_vm1, %v675_v30 }
 0x116   : > { %v676_v32 = vpop.trf.xlu0  ;;  %v692_v33 = vpop.trf.xlu1 }
 0x117   : > { %3419 = vmatmul.mubr.msk.bf16.vlgmr.msra.gmra.mrb[0].mxu0 %vm864_vm1, %v676_v32 }
 0x11a   : > { %v677_v34 = vpop.trf.xlu0  ;;  %v693_v35 = vpop.trf.xlu1 }
 0x11b   : > { %3422 = vmatprep.mubr.msk.bf16.mxu0 %vm864_vm1, %v677_v34 }
 0x11e   : > { %v678_v38 = vpop.trf.xlu0  ;;  %v694_v39 = vpop.trf.xlu1 }
 0x11f   : > { %3423 = vmatmul.mubr.msk.bf16.gmra.mrb[4].mxu0 %vm864_vm1, %v678_v38 }
 0x120   : > { %731 = vxpose.xlu0.c.b16.start.end [1/1] (short) %v3850_v36, 128  ;;  %827 = vxpose.xlu1.c.b16.start.end [1/1] (short) %v3852_v37, 128 }
 0x122   : > { %v679_v40 = vpop.trf.xlu0  ;;  %v695_v41 = vpop.trf.xlu1 }
 0x123   : > { %3426 = vmatprep.mubr.msk.bf16.mxu0 %vm864_vm1, %v679_v40 }
 0x126   : > { %v680_v42 = vpop.trf.xlu0  ;;  %v696_v43 = vpop.trf.xlu1 }
 0x127   : > { %3427 = vmatmul.mubr.msk.bf16.gmra.mrb[8].mxu0 %vm864_vm1, %v680_v42 }
 0x12a   : > { %v681_v44 = vpop.trf.xlu0  ;;  %v697_v45 = vpop.trf.xlu1 }
 0x12b   : > { %3430 = vmatprep.mubr.msk.bf16.mxu0 %vm864_vm1, %v681_v44 }
 0x12e   : > { %v682_v46 = vpop.trf.xlu0  ;;  %v698_v47 = vpop.trf.xlu1 }
 0x12f   : > { %3431 = vmatmul.mubr.msk.bf16.gmra.mrb[12].mxu0 %vm864_vm1, %v682_v46 }
 0x130   : > { %3434 = vmatprep.mubr.msk.bf16.mxu0 %vm864_vm1, %v691_v31 }
 0x132   : > { %v771_v48 = vpop.trf.xlu0  ;;  %v787_v49 = vpop.trf.xlu1 }
 0x133   : > { %3514 = vmatprep.mubr.msk.bf16.mxu1 %vm864_vm1, %v771_v48 }
 0x136   : > { %v772_v50 = vpop.trf.xlu0  ;;  %v788_v51 = vpop.trf.xlu1 }
 0x137   : > { %3435 = vmatmul.mubr.msk.bf16.gmra.mrb[16].mxu0 %vm864_vm1, %v692_v33  ;;  %3515 = vmatmul.mubr.msk.bf16.vlgmr.msra.gmra.mrb[0].mxu1 %vm864_vm1, %v772_v50 }
 0x138   : > { %3438 = vmatprep.mubr.msk.bf16.mxu0 %vm864_vm1, %v693_v35 }
 0x13a   : > { %v773_v53 = vpop.trf.xlu0  ;;  %v789_v55 = vpop.trf.xlu1 }
 0x13b   : > { %3518 = vmatprep.mubr.msk.bf16.mxu1 %vm864_vm1, %v773_v53 }
 0x13d   : > { %747 = vxpose.xlu0.c.b16.start.end [1/1] (short) %v3854_v52, 128  ;;  %843 = vxpose.xlu1.c.b16.start.end [1/1] (short) %v3855_v54, 128 }
 0x13e   : > { %v774_v56 = vpop.trf.xlu0  ;;  %v790_v57 = vpop.trf.xlu1 }
 0x13f   : > { %3439 = vmatmul.mubr.msk.bf16.gmra.mrb[20].mxu0 %vm864_vm1, %v694_v39  ;;  %3519 = vmatmul.mubr.msk.bf16.gmra.mrb[4].mxu1 %vm864_vm1, %v774_v56 }
 0x140   : > { %3442 = vmatprep.mubr.msk.bf16.mxu0 %vm864_vm1, %v695_v41 }
 0x142   : > { %v775_v58 = vpop.trf.xlu0  ;;  %v791_v59 = vpop.trf.xlu1 }
 0x143   : > { %3522 = vmatprep.mubr.msk.bf16.mxu1 %vm864_vm1, %v775_v58 }
 0x146   : > { %v776_v60 = vpop.trf.xlu0  ;;  %v792_v61 = vpop.trf.xlu1 }
 0x147   : > { %3443 = vmatmul.mubr.msk.bf16.gmra.mrb[24].mxu0 %vm864_vm1, %v696_v43  ;;  %3523 = vmatmul.mubr.msk.bf16.gmra.mrb[8].mxu1 %vm864_vm1, %v776_v60 }
 0x148   : > { %3446 = vmatprep.mubr.msk.bf16.mxu0 %vm864_vm1, %v697_v45 }
 0x14a   : > { %v777_v62 = vpop.trf.xlu0  ;;  %v793_v63 = vpop.trf.xlu1 }
 0x14b   : > { %3526 = vmatprep.mubr.msk.bf16.mxu1 %vm864_vm1, %v777_v62 }
 0x14e   : > { %v778_v0 = vpop.trf.xlu0  ;;  %v794_v1 = vpop.trf.xlu1 }
 0x14f   : > { %3447 = vmatmul.mubr.msk.bf16.gmra.mrb[28].mxu0 %vm864_vm1, %v698_v47  ;;  %3527 = vmatmul.mubr.msk.bf16.gmra.mrb[12].mxu1 %vm864_vm1, %v778_v0 }
 0x150   : > { %3530 = vmatprep.mubr.msk.bf16.mxu1 %vm864_vm1, %v787_v49 }
 0x152   : > { %v707_v2 = vpop.trf.xlu0  ;;  %v803_v3 = vpop.trf.xlu1 }
 0x153   : > { %3450 = vmatprep.mubr.msk.bf16.mxu0 %vm864_vm1, %v707_v2 }
 0x156   : > { %v708_v4 = vpop.trf.xlu0  ;;  %v804_v5 = vpop.trf.xlu1 }
 0x157   : > { %3451 = vmatmul.mubr.msk.bf16.gmra.mrb[32].mxu0 %vm864_vm1, %v708_v4  ;;  %3531 = vmatmul.mubr.msk.bf16.gmra.mrb[16].mxu1 %vm864_vm1, %v788_v51 }
 0x158   : > { %3534 = vmatprep.mubr.msk.bf16.mxu1 %vm864_vm1, %v789_v55 }
 0x15a   : > { %v709_v6 = vpop.trf.xlu0  ;;  %v805_v7 = vpop.trf.xlu1 }
 0x15b   : > { %3454 = vmatprep.mubr.msk.bf16.mxu0 %vm864_vm1, %v709_v6 }
 0x15e   : > { %v710_v8 = vpop.trf.xlu0  ;;  %v806_v9 = vpop.trf.xlu1 }
 0x15f   : > { %3455 = vmatmul.mubr.msk.bf16.gmra.mrb[36].mxu0 %vm864_vm1, %v710_v8  ;;  %3535 = vmatmul.mubr.msk.bf16.gmra.mrb[20].mxu1 %vm864_vm1, %v790_v57 }
 0x160   : > { %3538 = vmatprep.mubr.msk.bf16.mxu1 %vm864_vm1, %v791_v59 }
 0x162   : > { %v711_v10 = vpop.trf.xlu0  ;;  %v807_v11 = vpop.trf.xlu1 }
 0x163   : > { %3458 = vmatprep.mubr.msk.bf16.mxu0 %vm864_vm1, %v711_v10 }
 0x166   : > { %v712_v12 = vpop.trf.xlu0  ;;  %v808_v13 = vpop.trf.xlu1 }
 0x167   : > { %3459 = vmatmul.mubr.msk.bf16.gmra.mrb[40].mxu0 %vm864_vm1, %v712_v12  ;;  %3539 = vmatmul.mubr.msk.bf16.gmra.mrb[24].mxu1 %vm864_vm1, %v792_v61 }
 0x168   : > { %3542 = vmatprep.mubr.msk.bf16.mxu1 %vm864_vm1, %v793_v63 }
 0x16a   : > { %v713_v14 = vpop.trf.xlu0  ;;  %v809_v15 = vpop.trf.xlu1 }
 0x16b   : > { %3462 = vmatprep.mubr.msk.bf16.mxu0 %vm864_vm1, %v713_v14 }
 0x16e   : > { %v714_v16 = vpop.trf.xlu0  ;;  %v810_v17 = vpop.trf.xlu1 }
 0x16f   : > { %3463 = vmatmul.mubr.msk.bf16.gmra.mrb[44].mxu0 %vm864_vm1, %v714_v16  ;;  %3543 = vmatmul.mubr.msk.bf16.gmra.mrb[28].mxu1 %vm864_vm1, %v794_v1 }
 0x170   : > { %3546 = vmatprep.mubr.msk.bf16.mxu1 %vm864_vm1, %v803_v3 }
 0x172   : > { %v723_v18 = vpop.trf.xlu0  ;;  %v819_v19 = vpop.trf.xlu1 }
 0x173   : > { %3466 = vmatprep.mubr.msk.bf16.mxu0 %vm864_vm1, %v723_v18 }
 0x176   : > { %v724_v20 = vpop.trf.xlu0  ;;  %v820_v21 = vpop.trf.xlu1 }
 0x177   : > { %3467 = vmatmul.mubr.msk.bf16.gmra.mrb[48].mxu0 %vm864_vm1, %v724_v20  ;;  %3547 = vmatmul.mubr.msk.bf16.gmra.mrb[32].mxu1 %vm864_vm1, %v804_v5 }
 0x178   : > { %3550 = vmatprep.mubr.msk.bf16.mxu1 %vm864_vm1, %v805_v7 }
 0x17a   : > { %v725_v22 = vpop.trf.xlu0  ;;  %v821_v23 = vpop.trf.xlu1 }
 0x17b   : > { %3470 = vmatprep.mubr.msk.bf16.mxu0 %vm864_vm1, %v725_v22 }
 0x17e   : > { %v726_v24 = vpop.trf.xlu0  ;;  %v822_v25 = vpop.trf.xlu1 }
 0x17f   : > { %3471 = vmatmul.mubr.msk.bf16.gmra.mrb[52].mxu0 %vm864_vm1, %v726_v24  ;;  %3551 = vmatmul.mubr.msk.bf16.gmra.mrb[36].mxu1 %vm864_vm1, %v806_v9 }
 0x180   : > { %3554 = vmatprep.mubr.msk.bf16.mxu1 %vm864_vm1, %v807_v11 }
 0x182   : > { %v727_v26 = vpop.trf.xlu0  ;;  %v823_v27 = vpop.trf.xlu1 }
 0x183   : > { %3474 = vmatprep.mubr.msk.bf16.mxu0 %vm864_vm1, %v727_v26 }
 0x186   : > { %v728_v28 = vpop.trf.xlu0  ;;  %v824_v29 = vpop.trf.xlu1 }
 0x187   : > { %3475 = vmatmul.mubr.msk.bf16.gmra.mrb[56].mxu0 %vm864_vm1, %v728_v28  ;;  %3555 = vmatmul.mubr.msk.bf16.gmra.mrb[40].mxu1 %vm864_vm1, %v808_v13 }
 0x188   : > { %3558 = vmatprep.mubr.msk.bf16.mxu1 %vm864_vm1, %v809_v15 }
 0x18a   : > { %v729_v30 = vpop.trf.xlu0  ;;  %v825_v31 = vpop.trf.xlu1 }
 0x18b   : > { %3478 = vmatprep.mubr.msk.bf16.mxu0 %vm864_vm1, %v729_v30 }
 0x18e   : > { %v730_v32 = vpop.trf.xlu0  ;;  %v826_v33 = vpop.trf.xlu1 }
 0x18f   : > { %3479 = vmatmul.mubr.msk.bf16.gmra.mrb[60].mxu0 %vm864_vm1, %v730_v32  ;;  %3559 = vmatmul.mubr.msk.bf16.gmra.mrb[44].mxu1 %vm864_vm1, %v810_v17 }
 0x190   : > { %3562 = vmatprep.mubr.msk.bf16.mxu1 %vm864_vm1, %v819_v19 }
 0x192   : > { %v739_v34 = vpop.trf.xlu0  ;;  %v835_v35 = vpop.trf.xlu1 }
 0x193   : > { %3482 = vmatprep.mubr.msk.bf16.mxu0 %vm864_vm1, %v739_v34 }
 0x196   : > { %v740_v36 = vpop.trf.xlu0  ;;  %v836_v37 = vpop.trf.xlu1 }
 0x197   : > { %3483 = vmatmul.mubr.msk.bf16.gmra.mrb[64].mxu0 %vm864_vm1, %v740_v36  ;;  %3563 = vmatmul.mubr.msk.bf16.gmra.mrb[48].mxu1 %vm864_vm1, %v820_v21 }
 0x198   : > { %3566 = vmatprep.mubr.msk.bf16.mxu1 %vm864_vm1, %v821_v23 }
 0x19a   : > { %v741_v38 = vpop.trf.xlu0  ;;  %v837_v39 = vpop.trf.xlu1 }
 0x19b   : > { %3486 = vmatprep.mubr.msk.bf16.mxu0 %vm864_vm1, %v741_v38 }
 0x19e   : > { %v742_v40 = vpop.trf.xlu0  ;;  %v838_v42 = vpop.trf.xlu1 }
 0x19f   : > { %3487 = vmatmul.mubr.msk.bf16.gmra.mrb[68].mxu0 %vm864_vm1, %v742_v40  ;;  %3567 = vmatmul.mubr.msk.bf16.gmra.mrb[52].mxu1 %vm864_vm1, %v822_v25 }
 0x1a0   : > { %3570 = vmatprep.mubr.msk.bf16.mxu1 %vm864_vm1, %v823_v27 }
 0x1a2   : > { %v743_v41 = vpop.trf.xlu0  ;;  %v839_v44 = vpop.trf.xlu1 }
 0x1a3   : > { %3490 = vmatprep.mubr.msk.bf16.mxu0 %vm864_vm1, %v743_v41 }
 0x1a6   : > { %v744_v43 = vpop.trf.xlu0  ;;  %v840_v47 = vpop.trf.xlu1 }
 0x1a7   : > { %3491 = vmatmul.mubr.msk.bf16.gmra.mrb[72].mxu0 %vm864_vm1, %v744_v43  ;;  %3571 = vmatmul.mubr.msk.bf16.gmra.mrb[56].mxu1 %vm864_vm1, %v824_v29 }
 0x1a8   : > { %3574 = vmatprep.mubr.msk.bf16.mxu1 %vm864_vm1, %v825_v31 }
 0x1aa   : > { %v745_v45 = vpop.trf.xlu0  ;;  %v841_v49 = vpop.trf.xlu1 }
 0x1ab   : > { %3494 = vmatprep.mubr.msk.bf16.mxu0 %vm864_vm1, %v745_v45 }
 0x1ae   : > { %v746_v46 = vpop.trf.xlu0  ;;  %v842_v52 = vpop.trf.xlu1 }
 0x1af   : > { %3495 = vmatmul.mubr.msk.bf16.gmra.mrb[76].mxu0 %vm864_vm1, %v746_v46  ;;  %3575 = vmatmul.mubr.msk.bf16.gmra.mrb[60].mxu1 %vm864_vm1, %v826_v33 }
 0x1b0   : > { %3578 = vmatprep.mubr.msk.bf16.mxu1 %vm864_vm1, %v835_v35 }
 0x1b2   : > { %v755_v48 = vpop.trf.xlu0  ;;  %v851_v54 = vpop.trf.xlu1 }
 0x1b3   : > { %3498 = vmatprep.mubr.msk.bf16.mxu0 %vm864_vm1, %v755_v48 }
 0x1b6   : > { %v756_v50 = vpop.trf.xlu0  ;;  %v852_v57 = vpop.trf.xlu1 }
 0x1b7   : > { %3499 = vmatmul.mubr.msk.bf16.gmra.mrb[80].mxu0 %vm864_vm1, %v756_v50  ;;  %3579 = vmatmul.mubr.msk.bf16.gmra.mrb[64].mxu1 %vm864_vm1, %v836_v37 }
 0x1b8   : > { %3582 = vmatprep.mubr.msk.bf16.mxu1 %vm864_vm1, %v837_v39 }
 0x1ba   : > { %v757_v51 = vpop.trf.xlu0  ;;  %v853_v59 = vpop.trf.xlu1 }
 0x1bb   : > { %3502 = vmatprep.mubr.msk.bf16.mxu0 %vm864_vm1, %v757_v51  ;;  %v4585_v51 = vld [vmem:[%s4968_s2] ss:$0 sm:$0xff] }
 0x1be   : > { %v758_v53 = vpop.trf.xlu0  ;;  %v854_v61 = vpop.trf.xlu1 }
 0x1bf   : > { %3503 = vmatmul.mubr.msk.bf16.gmra.mrb[84].mxu0 %vm864_vm1, %v758_v53  ;;  %3583 = vmatmul.mubr.msk.bf16.gmra.mrb[68].mxu1 %vm864_vm1, %v838_v42 }
 0x1c0   : > { %3586 = vmatprep.mubr.msk.bf16.mxu1 %vm864_vm1, %v839_v44 }
 0x1c2   : > { %v759_v55 = vpop.trf.xlu0  ;;  %v855_v62 = vpop.trf.xlu1 }
 0x1c3   : > { %3506 = vmatprep.mubr.msk.bf16.mxu0 %vm864_vm1, %v759_v55 }
 0x1c6   : > { %v760_v56 = vpop.trf.xlu0  ;;  %v856_v63 = vpop.trf.xlu1 }
 0x1c7   : > { %3507 = vmatmul.mubr.msk.bf16.gmra.mrb[88].mxu0 %vm864_vm1, %v760_v56  ;;  %3587 = vmatmul.mubr.msk.bf16.gmra.mrb[72].mxu1 %vm864_vm1, %v840_v47 }
 0x1c8   : > { %3590 = vmatprep.mubr.msk.bf16.mxu1 %vm864_vm1, %v841_v49 }
 0x1ca   : > { %v761_v58 = vpop.trf.xlu0  ;;  %v857_v0 = vpop.trf.xlu1 }
 0x1cb   : > { %3510 = vmatprep.mubr.msk.bf16.mxu0 %vm864_vm1, %v761_v58 }
 0x1ce   : > { %v762_v60 = vpop.trf.xlu0  ;;  %v858_v4 = vpop.trf.xlu1 }
 0x1cf   : > { %3511 = vmatmul.mubr.msk.bf16.gmra.mrb[92].mxu0 %vm864_vm1, %v762_v60  ;;  %3591 = vmatmul.mubr.msk.bf16.gmra.mrb[76].mxu1 %vm864_vm1, %v842_v52 }
 0x1d0   : > { %3594 = vmatprep.mubr.msk.bf16.mxu1 %vm864_vm1, %v851_v54 }
 0x1d7   : > { %3595 = vmatmul.mubr.msk.bf16.gmra.mrb[80].mxu1 %vm864_vm1, %v852_v57 }
 0x1d8   : > { %3598 = vmatprep.mubr.msk.bf16.mxu1 %vm864_vm1, %v853_v59 }
 0x1df   : > { %3599 = vmatmul.mubr.msk.bf16.gmra.mrb[84].mxu1 %vm864_vm1, %v854_v61 }
 0x1e0   : > { %3602 = vmatprep.mubr.msk.bf16.mxu1 %vm864_vm1, %v855_v62 }
 0x1e7   : > { %3603 = vmatmul.mubr.msk.bf16.gmra.mrb[88].mxu1 %vm864_vm1, %v856_v63 }
 0x1e8   : > { %3606 = vmatprep.mubr.msk.bf16.mxu1 %vm864_vm1, %v857_v0 }
 0x1ea   : > { %v3420_v1 = vpop.f32.mrb[0].mxu0 }
 0x1eb   : > { %v1191_v2 = vpop.f32.mrb[1].mxu0  ;;  %v1962_v9 = vsel %vm1958_vm2, %v3420_v1, -inf }
 0x1ec   : > { %v3421_v3 = vpop.f32.mrb[2].mxu0  ;;  %v1959_v6 = vsel %vm1958_vm2, %v1191_v2, -inf }
 0x1ed   : > { %v1194_v5 = vpop.f32.mrb[3].mxu0  ;;  %v1964_v11 = vsel %vm1958_vm2, %v3421_v3, -inf }
 0x1ee   : > { %v1960_v7 = vsel %vm1958_vm2, %v1194_v5, -inf }
 0x1ef   : > { %v1961_v8 = vmax.f32 %v1959_v6, %v1960_v7  ;;  %3607 = vmatmul.mubr.msk.bf16.gmra.mrb[92].mxu1 %vm864_vm1, %v858_v4 }
 0x1f1   : > { %v1963_v10 = vmax.f32 %v1961_v8, %v1962_v9 }
 0x1f2   : > { %v3424_v12 = vpop.f32.mrb[4].mxu0 }
 0x1f3   : > { %v1965_v13 = vmax.f32 %v1963_v10, %v1964_v11  ;;  %v1207_v14 = vpop.f32.mrb[5].mxu0  ;;  %v1975_v22 = vsel %vm1958_vm2, %v3424_v12, -inf }
 0x1f4   : > { %v3425_v15 = vpop.f32.mrb[6].mxu0  ;;  %v1972_v18 = vsel %vm1958_vm2, %v1207_v14, -inf }
 0x1f5   : > { %v1966_v16 = vrot.slane %v1965_v13, 4  ;;  %v1210_v17 = vpop.f32.mrb[7].mxu0  ;;  %v1977_v25 = vsel %vm1958_vm2, %v3425_v15, -inf }
 0x1f6   : > { %v1973_v19 = vsel %vm1958_vm2, %v1210_v17, -inf }
 0x1f7   : > { %v1967_v20 = vmax.f32 %v1965_v13, %v1966_v16  ;;  %v1974_v21 = vmax.f32 %v1972_v18, %v1973_v19 }
 0x1f9   : > { %v1968_v23 = vrot.slane %v1967_v20, 2  ;;  %v1976_v24 = vmax.f32 %v1974_v21, %v1975_v22 }
 0x1fa   : > { %v3428_v26 = vpop.f32.mrb[8].mxu0 }
 0x1fb   : > { %v1978_v27 = vmax.f32 %v1976_v24, %v1977_v25  ;;  %v1223_v28 = vpop.f32.mrb[9].mxu0  ;;  %v1969_v30 = vmax.f32 %v1967_v20, %v1968_v23  ;;  %v1988_v37 = vsel %vm1958_vm2, %v3428_v26, -inf }
 0x1fc   : > { %v3429_v29 = vpop.f32.mrb[10].mxu0  ;;  %v1985_v33 = vsel %vm1958_vm2, %v1223_v28, -inf }
 0x1fd   : > { %v1979_v31 = vrot.slane %v1978_v27, 4  ;;  %v1226_v32 = vpop.f32.mrb[11].mxu0  ;;  %v1970_v38 = vrot.slane %v1969_v30, 1  ;;  %v1990_v41 = vsel %vm1958_vm2, %v3429_v29, -inf }
 0x1fe   : > { %v1986_v34 = vsel %vm1958_vm2, %v1226_v32, -inf }
 0x1ff   : > { %v1980_v35 = vmax.f32 %v1978_v27, %v1979_v31  ;;  %v1987_v36 = vmax.f32 %v1985_v33, %v1986_v34  ;;  %v1971_v47 = vmax.f32 %v1969_v30, %v1970_v38 }
 0x201   : > { %v1981_v39 = vrot.slane %v1980_v35, 2  ;;  %v1989_v40 = vmax.f32 %v1987_v36, %v1988_v37  ;;  %v2590_v58 = vadd.f32 %v4585_v51, %v1971_v47 }
 0x202   : > { %v3432_v42 = vpop.f32.mrb[12].mxu0 }
 0x203   : > { %v1982_v43 = vmax.f32 %v1980_v35, %v1981_v39  ;;  %v1991_v44 = vmax.f32 %v1989_v40, %v1990_v41  ;;  %v1239_v45 = vpop.f32.mrb[13].mxu0  ;;  %v2001_v57 = vsel %vm1958_vm2, %v3432_v42, -inf  ;;  %v2638_v8 = vmax.f32 %v2590_v58, 0.0 }
 0x204   : > { %v3433_v46 = vpop.f32.mrb[14].mxu0  ;;  %v1998_v52 = vsel %vm1958_vm2, %v1239_v45, -inf }
 0x205   : > { %v1983_v48 = vrot.slane %v1982_v43, 1  ;;  %v1992_v49 = vrot.slane %v1991_v44, 4  ;;  %v1242_v50 = vpop.f32.mrb[15].mxu0  ;;  %v2003_v62 = vsel %vm1958_vm2, %v3433_v46, -inf }
 0x206   : > { %v1999_v53 = vsel %vm1958_vm2, %v1242_v50, -inf }
 0x207   : > { %v1984_v54 = vmax.f32 %v1982_v43, %v1983_v48  ;;  %v1993_v55 = vmax.f32 %v1991_v44, %v1992_v49  ;;  %v2000_v56 = vmax.f32 %v1998_v52, %v1999_v53 }
 0x209   : > { %v2591_v59 = vadd.f32 %v4585_v51, %v1984_v54  ;;  %v1994_v60 = vrot.slane %v1993_v55, 2  ;;  %v2002_v61 = vmax.f32 %v2000_v56, %v2001_v57 }
 0x20a   : > { %v3436_v63 = vpop.f32.mrb[16].mxu0  ;;  %v3516_v0 = vpop.f32.mrb[0].mxu1 }
 0x20b   : > { %v2639_v1 = vmax.f32 %v2591_v59, 0.0  ;;  %v1995_v2 = vmax.f32 %v1993_v55, %v1994_v60  ;;  %v2004_v3 = vmax.f32 %v2002_v61, %v2003_v62  ;;  %v1255_v4 = vpop.f32.mrb[17].mxu0  ;;  %v1575_v5 = vpop.f32.mrb[1].mxu1  ;;  %v2014_v22 = vsel %vm1958_vm2, %v3436_v63, -inf }
 0x20c   : > { %v3437_v6 = vpop.f32.mrb[18].mxu0  ;;  %v3517_v7 = vpop.f32.mrb[2].mxu1  ;;  %v2011_v14 = vsel %vm1958_vm2, %v1255_v4, -inf  ;;  %v2271_v15 = vsel %vm1958_vm2, %v1575_v5, -inf  ;;  %v2274_v26 = vsel %vm1958_vm2, %v3516_v0, -inf }
 0x20d   : > { %v2734_v9 = vrot.slane %v2639_v1, 7  ;;  %v1996_v10 = vrot.slane %v1995_v2, 1  ;;  %v2005_v11 = vrot.slane %v2004_v3, 4  ;;  %v1258_v12 = vpop.f32.mrb[19].mxu0  ;;  %v1578_v13 = vpop.f32.mrb[3].mxu1  ;;  %v2016_v28 = vsel %vm1958_vm2, %v3437_v6, -inf }
 0x20e   : > { %v2012_v16 = vsel %vm1958_vm2, %v1258_v12, -inf  ;;  %v2272_v17 = vsel %vm1958_vm2, %v1578_v13, -inf  ;;  %v2276_v34 = vsel %vm1958_vm2, %v3517_v7, -inf }
 0x20f   : > { %v2736_v18 = vsel %vm2735_vm3, %v2734_v9, %v2638_v8  ;;  %v1997_v19 = vmax.f32 %v1995_v2, %v1996_v10  ;;  %v2006_v20 = vmax.f32 %v2004_v3, %v2005_v11  ;;  %v2013_v21 = vmax.f32 %v2011_v14, %v2012_v16 }
 0x210   : > { %v2273_v23 = vmax.f32 %v2271_v15, %v2272_v17 }
 0x211   : > { %v2592_v24 = vadd.f32 %v4585_v51, %v1997_v19  ;;  %v2007_v25 = vrot.slane %v2006_v20, 2  ;;  %v2015_v27 = vmax.f32 %v2013_v21, %v2014_v22 }
 0x212   : > { %v2275_v29 = vmax.f32 %v2273_v23, %v2274_v26  ;;  %v3440_v30 = vpop.f32.mrb[20].mxu0  ;;  %v3520_v31 = vpop.f32.mrb[4].mxu1 }
 0x213   : > { %v2640_v32 = vmax.f32 %v2592_v24, 0.0  ;;  %v2008_v33 = vmax.f32 %v2006_v20, %v2007_v25  ;;  %v2017_v35 = vmax.f32 %v2015_v27, %v2016_v28  ;;  %v1271_v36 = vpop.f32.mrb[21].mxu0  ;;  %v1591_v37 = vpop.f32.mrb[5].mxu1  ;;  %v2027_v57 = vsel %vm1958_vm2, %v3440_v30, -inf }
 0x214   : > { %v2277_v38 = vmax.f32 %v2275_v29, %v2276_v34  ;;  %v3441_v39 = vpop.f32.mrb[22].mxu0  ;;  %v3521_v40 = vpop.f32.mrb[6].mxu1  ;;  %v2024_v44 = vsel %vm1958_vm2, %v1271_v36, -inf  ;;  %v2284_v48 = vsel %vm1958_vm2, %v1591_v37, -inf  ;;  %v2287_v61 = vsel %vm1958_vm2, %v3520_v31, -inf }
 0x215   : > { %v2737_v41 = vrot.slane %v2640_v32, 6  ;;  %v2009_v42 = vrot.slane %v2008_v33, 1  ;;  %v2018_v43 = vrot.slane %v2017_v35, 4  ;;  %v1274_v45 = vpop.f32.mrb[23].mxu0  ;;  %v1594_v46 = vpop.f32.mrb[7].mxu1  ;;  %v2029_v0 = vsel %vm1958_vm2, %v3441_v39, -inf }
 0x216   : > { %v2278_v47 = vrot.slane %v2277_v38, 4  ;;  %v2025_v49 = vsel %vm1958_vm2, %v1274_v45, -inf  ;;  %v2285_v50 = vsel %vm1958_vm2, %v1594_v46, -inf  ;;  %v2289_v6 = vsel %vm1958_vm2, %v3521_v40, -inf }
 0x217   : > { %v2739_v52 = vsel %vm2738_vm4, %v2737_v41, %v2736_v18  ;;  %v2010_v53 = vmax.f32 %v2008_v33, %v2009_v42  ;;  %v2019_v54 = vmax.f32 %v2017_v35, %v2018_v43  ;;  %v2026_v55 = vmax.f32 %v2024_v44, %v2025_v49 }
 0x218   : > { %v2279_v56 = vmax.f32 %v2277_v38, %v2278_v47  ;;  %v2286_v58 = vmax.f32 %v2284_v48, %v2285_v50 }
 0x219   : > { %v2593_v59 = vadd.f32 %v4585_v51, %v2010_v53  ;;  %v2020_v60 = vrot.slane %v2019_v54, 2  ;;  %v2028_v62 = vmax.f32 %v2026_v55, %v2027_v57 }
 0x21a   : > { %v2280_v63 = vrot.slane %v2279_v56, 2  ;;  %v2288_v1 = vmax.f32 %v2286_v58, %v2287_v61  ;;  %v3444_v2 = vpop.f32.mrb[24].mxu0  ;;  %v3524_v3 = vpop.f32.mrb[8].mxu1 }
 0x21b   : > { %v2641_v4 = vmax.f32 %v2593_v59, 0.0  ;;  %v2021_v5 = vmax.f32 %v2019_v54, %v2020_v60  ;;  %v2030_v7 = vmax.f32 %v2028_v62, %v2029_v0  ;;  %v1287_v8 = vpop.f32.mrb[25].mxu0  ;;  %v1607_v9 = vpop.f32.mrb[9].mxu1  ;;  %v2040_v33 = vsel %vm1958_vm2, %v3444_v2, -inf }
 0x21c   : > { %v2281_v10 = vmax.f32 %v2279_v56, %v2280_v63  ;;  %v2290_v11 = vmax.f32 %v2288_v1, %v2289_v6  ;;  %v3445_v12 = vpop.f32.mrb[26].mxu0  ;;  %v3525_v13 = vpop.f32.mrb[10].mxu1  ;;  %v2037_v21 = vsel %vm1958_vm2, %v1287_v8, -inf  ;;  %v2297_v22 = vsel %vm1958_vm2, %v1607_v9, -inf }
 0x21d   : > { %v2740_v14 = vrot.slane %v2641_v4, 5  ;;  %v2022_v15 = vrot.slane %v2021_v5, 1  ;;  %v2031_v16 = vrot.slane %v2030_v7, 4  ;;  %v1290_v17 = vpop.f32.mrb[27].mxu0  ;;  %v1610_v18 = vpop.f32.mrb[11].mxu1  ;;  %v2300_v37 = vsel %vm1958_vm2, %v3524_v3, -inf }
 0x21e   : > { %v2282_v19 = vrot.slane %v2281_v10, 1  ;;  %v2291_v20 = vrot.slane %v2290_v11, 4  ;;  %v2038_v26 = vsel %vm1958_vm2, %v1290_v17, -inf  ;;  %v2298_v30 = vsel %vm1958_vm2, %v1610_v18, -inf }
 0x21f   : > { %v2742_v23 = vsel %vm2741_vm5, %v2740_v14, %v2739_v52  ;;  %v2023_v24 = vmax.f32 %v2021_v5, %v2022_v15  ;;  %v2032_v25 = vmax.f32 %v2030_v7, %v2031_v16  ;;  %v2039_v29 = vmax.f32 %v2037_v21, %v2038_v26 }
 0x220   : > { %v2283_v27 = vmax.f32 %v2281_v10, %v2282_v19  ;;  %v2292_v28 = vmax.f32 %v2290_v11, %v2291_v20  ;;  %v2299_v34 = vmax.f32 %v2297_v22, %v2298_v30  ;;  %v2042_v43 = vsel %vm1958_vm2, %v3445_v12, -inf }
 0x221   : > { %v2594_v31 = vadd.f32 %v4585_v51, %v2023_v24  ;;  %v2033_v32 = vrot.slane %v2032_v25, 2  ;;  %v2041_v38 = vmax.f32 %v2039_v29, %v2040_v33  ;;  %v2302_v48 = vsel %vm1958_vm2, %v3525_v13, -inf }
 0x222   : > { %v4621_v35 = vadd.f32 %v4585_v51, %v2283_v27  ;;  %v2293_v36 = vrot.slane %v2292_v28, 2  ;;  %v3448_v39 = vpop.f32.mrb[28].mxu0  ;;  %v3528_v40 = vpop.f32.mrb[12].mxu1  ;;  %v2301_v44 = vmax.f32 %v2299_v34, %v2300_v37 }
 0x223   : > { %v2642_v41 = vmax.f32 %v2594_v31, 0.0  ;;  %v2034_v42 = vmax.f32 %v2032_v25, %v2033_v32  ;;  %v1303_v45 = vpop.f32.mrb[29].mxu0  ;;  %v1623_v46 = vpop.f32.mrb[13].mxu1  ;;  %v2043_v49 = vmax.f32 %v2041_v38, %v2042_v43  ;;  %v2053_v56 = vsel %vm1958_vm2, %v3448_v39, -inf }
 0x224   : > { %v2294_v47 = vmax.f32 %v2292_v28, %v2293_v36  ;;  %v3449_v50 = vpop.f32.mrb[30].mxu0  ;;  %v3529_v52 = vpop.f32.mrb[14].mxu1  ;;  %v2303_v55 = vmax.f32 %v2301_v44, %v2302_v48  ;;  %v2662_v59 = vmax.f32 %v4621_v35, 0.0  ;;  %v2050_v62 = vsel %vm1958_vm2, %v1303_v45, -inf }
 0x225   : > { %v2743_v53 = vrot.slane %v2642_v41, 4  ;;  %v2035_v54 = vrot.slane %v2034_v42, 1  ;;  %v1306_v57 = vpop.f32.mrb[31].mxu0  ;;  %v1626_v58 = vpop.f32.mrb[15].mxu1  ;;  %v2044_v61 = vrot.slane %v2043_v49, 4  ;;  %v2310_v2 = vsel %vm1958_vm2, %v1623_v46, -inf }
 0x226   : > { %v2295_v60 = vrot.slane %v2294_v47, 1  ;;  %v2304_v1 = vrot.slane %v2303_v55, 4  ;;  %v2051_v5 = vsel %vm1958_vm2, %v1306_v57, -inf  ;;  %v2311_v6 = vsel %vm1958_vm2, %v1626_v58, -inf }
 0x227   : > { %v2745_v63 = vsel %vm2744_vm6, %v2743_v53, %v2742_v23  ;;  %v2036_v0 = vmax.f32 %v2034_v42, %v2035_v54  ;;  %v2045_v4 = vmax.f32 %v2043_v49, %v2044_v61  ;;  %v2052_v9 = vmax.f32 %v2050_v62, %v2051_v5 }
 0x228   : > { %v2296_v3 = vmax.f32 %v2294_v47, %v2295_v60  ;;  %v2305_v8 = vmax.f32 %v2303_v55, %v2304_v1  ;;  %v2312_v10 = vmax.f32 %v2310_v2, %v2311_v6  ;;  %v2313_v13 = vsel %vm1958_vm2, %v3528_v40, -inf }
 0x229   : > { %v2595_v7 = vadd.f32 %v4585_v51, %v2036_v0  ;;  %v2046_v12 = vrot.slane %v2045_v4, 2  ;;  %v2055_v14 = vsel %vm1958_vm2, %v3449_v50, -inf  ;;  %v2054_v19 = vmax.f32 %v2052_v9, %v2053_v56 }
 0x22a   : > { %v2615_v11 = vadd.f32 %v4585_v51, %v2296_v3  ;;  %v3532_v15 = vpop.f32.mrb[16].mxu1  ;;  %v3452_v16 = vpop.f32.mrb[32].mxu0  ;;  %v2306_v18 = vrot.slane %v2305_v8, 2  ;;  %v2314_v20 = vmax.f32 %v2312_v10, %v2313_v13  ;;  %v2315_v25 = vsel %vm1958_vm2, %v3529_v52, -inf }
 0x22b   : > { %v2643_v17 = vmax.f32 %v2595_v7, 0.0  ;;  %v1639_v21 = vpop.f32.mrb[17].mxu1  ;;  %v1319_v22 = vpop.f32.mrb[33].mxu0  ;;  %v2047_v24 = vmax.f32 %v2045_v4, %v2046_v12  ;;  %v2326_v26 = vsel %vm1958_vm2, %v3532_v15, -inf  ;;  %v2056_v31 = vmax.f32 %v2054_v19, %v2055_v14 }
 0x22c   : > { %v2663_v23 = vmax.f32 %v2615_v11, 0.0  ;;  %v3533_v27 = vpop.f32.mrb[18].mxu1  ;;  %v3453_v28 = vpop.f32.mrb[34].mxu0  ;;  %v2307_v30 = vmax.f32 %v2305_v8, %v2306_v18  ;;  %v2316_v32 = vmax.f32 %v2314_v20, %v2315_v25  ;;  %v2323_v37 = vsel %vm1958_vm2, %v1639_v21, -inf }
 0x22d   : > { %v2746_v29 = vrot.slane %v2643_v17, 3  ;;  %v1642_v33 = vpop.f32.mrb[19].mxu1  ;;  %v1322_v34 = vpop.f32.mrb[35].mxu0  ;;  %v2048_v36 = vrot.slane %v2047_v24, 1  ;;  %v2057_v41 = vrot.slane %v2056_v31, 4  ;;  %v2328_v45 = vsel %vm1958_vm2, %v3533_v27, -inf }
 0x22e   : > { %v2783_v35 = vrot.slane %v2663_v23, 7  ;;  %v2324_v38 = vsel %vm1958_vm2, %v1642_v33, -inf  ;;  %v2308_v40 = vrot.slane %v2307_v30, 1  ;;  %v2317_v42 = vrot.slane %v2316_v32, 4 }
 0x22f   : > { %v2748_v39 = vsel %vm2747_vm7, %v2746_v29, %v2745_v63  ;;  %v2049_v44 = vmax.f32 %v2047_v24, %v2048_v36  ;;  %v2325_v46 = vmax.f32 %v2323_v37, %v2324_v38  ;;  %v2058_v48 = vmax.f32 %v2056_v31, %v2057_v41 }
 0x230   : > { %v2784_v43 = vsel %vm2735_vm3, %v2783_v35, %v2662_v59  ;;  %v2309_v47 = vmax.f32 %v2307_v30, %v2308_v40  ;;  %v2318_v49 = vmax.f32 %v2316_v32, %v2317_v42  ;;  %v2063_v50 = vsel %vm1958_vm2, %v1319_v22, -inf }
 0x231   : > { %v2596_v52 = vadd.f32 %v4585_v51, %v2049_v44  ;;  %v2327_v53 = vmax.f32 %v2325_v46, %v2326_v26  ;;  %v2066_v55 = vsel %vm1958_vm2, %v3452_v16, -inf  ;;  %v2064_v56 = vsel %vm1958_vm2, %v1322_v34, -inf }
 0x232   : > { %v3536_v54 = vpop.f32.mrb[20].mxu1  ;;  %v3456_v57 = vpop.f32.mrb[36].mxu0  ;;  %v2616_v58 = vadd.f32 %v4585_v51, %v2309_v47  ;;  %v2059_v59 = vrot.slane %v2058_v48, 2  ;;  %v2319_v60 = vrot.slane %v2318_v49, 2  ;;  %v2068_v62 = vsel %vm1958_vm2, %v3453_v28, -inf }
 0x233   : > { %v1655_v61 = vpop.f32.mrb[21].mxu1  ;;  %v1335_v63 = vpop.f32.mrb[37].mxu0  ;;  %v2644_v0 = vmax.f32 %v2596_v52, 0.0  ;;  %v2329_v1 = vmax.f32 %v2327_v53, %v2328_v45  ;;  %v2339_v2 = vsel %vm1958_vm2, %v3536_v54, -inf  ;;  %v2065_v4 = vmax.f32 %v2063_v50, %v2064_v56 }
 0x234   : > { %v3537_v3 = vpop.f32.mrb[22].mxu1  ;;  %v3457_v5 = vpop.f32.mrb[38].mxu0  ;;  %v2664_v6 = vmax.f32 %v2616_v58, 0.0  ;;  %v2060_v7 = vmax.f32 %v2058_v48, %v2059_v59  ;;  %v2320_v8 = vmax.f32 %v2318_v49, %v2319_v60  ;;  %v2336_v9 = vsel %vm1958_vm2, %v1655_v61, -inf }
 0x235   : > { %v1658_v10 = vpop.f32.mrb[23].mxu1  ;;  %v1338_v11 = vpop.f32.mrb[39].mxu0  ;;  %v2749_v12 = vrot.slane %v2644_v0, 2  ;;  %v2330_v13 = vrot.slane %v2329_v1, 4  ;;  %v2067_v15 = vmax.f32 %v2065_v4, %v2066_v55  ;;  %v2341_v22 = vsel %vm1958_vm2, %v3537_v3, -inf }
 0x236   : > { %v2337_v14 = vsel %vm1958_vm2, %v1658_v10, -inf  ;;  %v2785_v16 = vrot.slane %v2664_v6, 6  ;;  %v2061_v17 = vrot.slane %v2060_v7, 1  ;;  %v2321_v18 = vrot.slane %v2320_v8, 1 }
 0x237   : > { %v2338_v19 = vmax.f32 %v2336_v9, %v2337_v14  ;;  %v2751_v20 = vsel %vm2750_vm8, %v2749_v12, %v2748_v39  ;;  %v2331_v21 = vmax.f32 %v2329_v1, %v2330_v13  ;;  %v2069_v23 = vmax.f32 %v2067_v15, %v2068_v62 }
 0x238   : > { %v2786_v24 = vsel %vm2738_vm4, %v2785_v16, %v2784_v43  ;;  %v2062_v25 = vmax.f32 %v2060_v7, %v2061_v17  ;;  %v2322_v26 = vmax.f32 %v2320_v8, %v2321_v18  ;;  %v2079_v30 = vsel %vm1958_vm2, %v3456_v57, -inf }
 0x239   : > { %v2340_v27 = vmax.f32 %v2338_v19, %v2339_v2  ;;  %v2332_v28 = vrot.slane %v2331_v21, 2  ;;  %v2070_v29 = vrot.slane %v2069_v23, 4  ;;  %v2076_v31 = vsel %vm1958_vm2, %v1335_v63, -inf }
 0x23a   : > { %v3540_v32 = vpop.f32.mrb[24].mxu1  ;;  %v3460_v33 = vpop.f32.mrb[40].mxu0  ;;  %v2597_v34 = vadd.f32 %v4585_v51, %v2062_v25  ;;  %v2617_v35 = vadd.f32 %v4585_v51, %v2322_v26  ;;  %v2081_v37 = vsel %vm1958_vm2, %v3457_v5, -inf  ;;  %v2077_v43 = vsel %vm1958_vm2, %v1338_v11, -inf }
 0x23b   : > { %v2342_v36 = vmax.f32 %v2340_v27, %v2341_v22  ;;  %v1671_v38 = vpop.f32.mrb[25].mxu1  ;;  %v1351_v39 = vpop.f32.mrb[41].mxu0  ;;  %v2333_v40 = vmax.f32 %v2331_v21, %v2332_v28  ;;  %v2071_v41 = vmax.f32 %v2069_v23, %v2070_v29  ;;  %v2352_v42 = vsel %vm1958_vm2, %v3540_v32, -inf }
 0x23c   : > { %v3541_v44 = vpop.f32.mrb[26].mxu1  ;;  %v3461_v45 = vpop.f32.mrb[42].mxu0  ;;  %v2645_v46 = vmax.f32 %v2597_v34, 0.0  ;;  %v2665_v47 = vmax.f32 %v2617_v35, 0.0  ;;  %v2078_v49 = vmax.f32 %v2076_v31, %v2077_v43  ;;  %v2349_v55 = vsel %vm1958_vm2, %v1671_v38, -inf }
 0x23d   : > { %v2343_v48 = vrot.slane %v2342_v36, 4  ;;  %v1674_v50 = vpop.f32.mrb[27].mxu1  ;;  %v1354_v52 = vpop.f32.mrb[43].mxu0  ;;  %v2334_v53 = vrot.slane %v2333_v40, 1  ;;  %v2072_v54 = vrot.slane %v2071_v41, 2  ;;  %v2092_v56 = vsel %vm1958_vm2, %v3460_v33, -inf }
 0x23e   : > { %v2752_v57 = vrot.slane %v2645_v46, 1  ;;  %v2787_v58 = vrot.slane %v2665_v47, 5  ;;  %v2080_v60 = vmax.f32 %v2078_v49, %v2079_v30  ;;  %v2089_v63 = vsel %vm1958_vm2, %v1351_v39, -inf }
 0x23f   : > { %v2344_v59 = vmax.f32 %v2342_v36, %v2343_v48  ;;  %v2335_v61 = vmax.f32 %v2333_v40, %v2334_v53  ;;  %v2073_v62 = vmax.f32 %v2071_v41, %v2072_v54  ;;  %v2350_v0 = vsel %vm1958_vm2, %v1674_v50, -inf }
 0x240   : > { %v2754_v1 = vsel %vm2753_vm9, %v2752_v57, %v2751_v20  ;;  %v2788_v2 = vsel %vm2741_vm5, %v2787_v58, %v2786_v24  ;;  %v2082_v4 = vmax.f32 %v2080_v60, %v2081_v37  ;;  %v2354_v7 = vsel %vm1958_vm2, %v3541_v44, -inf }
 0x241   : > { %v2345_v3 = vrot.slane %v2344_v59, 2  ;;  %2831 = vst.msk [vmem:[%s4674_s12] sm:$0xff] %vm1958_vm2, %v2754_v1  ;;  %v2618_v5 = vadd.f32 %v4585_v51, %v2335_v61  ;;  %v2074_v6 = vrot.slane %v2073_v62, 1  ;;  %v2351_v8 = vmax.f32 %v2349_v55, %v2350_v0 }
 0x242   : > { %v3464_v9 = vpop.f32.mrb[44].mxu0  ;;  %v3544_v10 = vpop.f32.mrb[28].mxu1  ;;  %v2083_v12 = vrot.slane %v2082_v4, 4  ;;  %v2094_v13 = vsel %vm1958_vm2, %v3461_v45, -inf  ;;  %v2090_v14 = vsel %vm1958_vm2, %v1354_v52, -inf }
 0x243   : > { %v2346_v11 = vmax.f32 %v2344_v59, %v2345_v3  ;;  %v1367_v15 = vpop.f32.mrb[45].mxu0  ;;  %v1687_v16 = vpop.f32.mrb[29].mxu1  ;;  %v2666_v17 = vmax.f32 %v2618_v5, 0.0  ;;  %v2075_v18 = vmax.f32 %v2073_v62, %v2074_v6  ;;  %v2353_v19 = vmax.f32 %v2351_v8, %v2352_v42 }
 0x244   : > { %v2091_v20 = vmax.f32 %v2089_v63, %v2090_v14  ;;  %v3465_v21 = vpop.f32.mrb[46].mxu0  ;;  %v3545_v22 = vpop.f32.mrb[30].mxu1  ;;  %v2084_v24 = vmax.f32 %v2082_v4, %v2083_v12  ;;  %v2105_v25 = vsel %vm1958_vm2, %v3464_v9, -inf  ;;  %v2365_v26 = vsel %vm1958_vm2, %v3544_v10, -inf }
 0x245   : > { %v2347_v23 = vrot.slane %v2346_v11, 1  ;;  %v1370_v27 = vpop.f32.mrb[47].mxu0  ;;  %v1690_v28 = vpop.f32.mrb[31].mxu1  ;;  %v2789_v29 = vrot.slane %v2666_v17, 4  ;;  %v4685_v30 = vadd.f32 %v4585_v51, %v2075_v18  ;;  %v2355_v31 = vmax.f32 %v2353_v19, %v2354_v7 }
 0x246   : > { %v2093_v32 = vmax.f32 %v2091_v20, %v2092_v56  ;;  %v2085_v34 = vrot.slane %v2084_v24, 2  ;;  %v2102_v35 = vsel %vm1958_vm2, %v1367_v15, -inf  ;;  %v2362_v36 = vsel %vm1958_vm2, %v1687_v16, -inf }
 0x247   : > { %v2348_v33 = vmax.f32 %v2346_v11, %v2347_v23  ;;  %v2790_v37 = vsel %vm2744_vm6, %v2789_v29, %v2788_v2  ;;  %v2356_v38 = vrot.slane %v2355_v31, 4  ;;  %v2107_v40 = vsel %vm1958_vm2, %v3465_v21, -inf }
 0x248   : > { %v2095_v39 = vmax.f32 %v2093_v32, %v2094_v13  ;;  %v2646_v42 = vmax.f32 %v4685_v30, 0.0  ;;  %v2086_v43 = vmax.f32 %v2084_v24, %v2085_v34  ;;  %v2103_v44 = vsel %vm1958_vm2, %v1370_v27, -inf }
 0x249   : > { %v2619_v41 = vadd.f32 %v4585_v51, %v2348_v33  ;;  %v2357_v45 = vmax.f32 %v2355_v31, %v2356_v38  ;;  %v2104_v47 = vmax.f32 %v2102_v35, %v2103_v44  ;;  %v2363_v48 = vsel %vm1958_vm2, %v1690_v28, -inf }
 0x24a   : > { %v2096_v46 = vrot.slane %v2095_v39, 4  ;;  %v3468_v49 = vpop.f32.mrb[48].mxu0  ;;  %v3548_v50 = vpop.f32.mrb[32].mxu1  ;;  %v2087_v53 = vrot.slane %v2086_v43, 1  ;;  %v2367_v54 = vsel %vm1958_vm2, %v3545_v22, -inf  ;;  %v2364_v55 = vmax.f32 %v2362_v36, %v2363_v48 }
 0x24b   : > { %v2667_v52 = vmax.f32 %v2619_v41, 0.0  ;;  %v1383_v56 = vpop.f32.mrb[49].mxu0  ;;  %v1703_v57 = vpop.f32.mrb[33].mxu1  ;;  %v2358_v58 = vrot.slane %v2357_v45, 2  ;;  %v2106_v60 = vmax.f32 %v2104_v47, %v2105_v25  ;;  %v2118_v61 = vsel %vm1958_vm2, %v3468_v49, -inf }
 0x24c   : > { %v2097_v59 = vmax.f32 %v2095_v39, %v2096_v46  ;;  %v3469_v62 = vpop.f32.mrb[50].mxu0  ;;  %v3549_v63 = vpop.f32.mrb[34].mxu1  ;;  %v2088_v1 = vmax.f32 %v2086_v43, %v2087_v53  ;;  %v2366_v2 = vmax.f32 %v2364_v55, %v2365_v26  ;;  %v2378_v3 = vsel %vm1958_vm2, %v3548_v50, -inf }
 0x24d   : > { %v2791_v0 = vrot.slane %v2667_v52, 3  ;;  %v1386_v4 = vpop.f32.mrb[51].mxu0  ;;  %v1706_v5 = vpop.f32.mrb[35].mxu1  ;;  %v2359_v6 = vmax.f32 %v2357_v45, %v2358_v58  ;;  %v2108_v8 = vmax.f32 %v2106_v60, %v2107_v40  ;;  %v2115_v9 = vsel %vm1958_vm2, %v1383_v56, -inf }
 0x24e   : > { %v2098_v7 = vrot.slane %v2097_v59, 2  ;;  %v2599_v11 = vadd.f32 %v4585_v51, %v2088_v1  ;;  %v2368_v12 = vmax.f32 %v2366_v2, %v2367_v54  ;;  %v2375_v13 = vsel %vm1958_vm2, %v1703_v57, -inf }
 0x24f   : > { %v2792_v10 = vsel %vm2747_vm7, %v2791_v0, %v2790_v37  ;;  %v2360_v14 = vrot.slane %v2359_v6, 1  ;;  %v2109_v16 = vrot.slane %v2108_v8, 4  ;;  %v2120_v17 = vsel %vm1958_vm2, %v3469_v62, -inf }
 0x250   : > { %v2099_v15 = vmax.f32 %v2097_v59, %v2098_v7  ;;  %v2647_v18 = vmax.f32 %v2599_v11, 0.0  ;;  %v2369_v19 = vrot.slane %v2368_v12, 4  ;;  %v2116_v20 = vsel %vm1958_vm2, %v1386_v4, -inf }
 0x251   : > { %v2376_v21 = vsel %vm1958_vm2, %v1706_v5, -inf  ;;  %v2361_v22 = vmax.f32 %v2359_v6, %v2360_v14  ;;  %v2110_v24 = vmax.f32 %v2108_v8, %v2109_v16  ;;  %v2117_v25 = vmax.f32 %v2115_v9, %v2116_v20 }
 0x252   : > { %v2100_v23 = vrot.slane %v2099_v15, 1  ;;  %v3472_v26 = vpop.f32.mrb[52].mxu0  ;;  %v3552_v27 = vpop.f32.mrb[36].mxu1  ;;  %v2755_v28 = vrot.slane %v2647_v18, 7  ;;  %v2370_v29 = vmax.f32 %v2368_v12, %v2369_v19  ;;  %v2380_v30 = vsel %vm1958_vm2, %v3549_v63, -inf }
 0x253   : > { %v2377_v31 = vmax.f32 %v2375_v13, %v2376_v21  ;;  %v1399_v32 = vpop.f32.mrb[53].mxu0  ;;  %v1719_v33 = vpop.f32.mrb[37].mxu1  ;;  %v2620_v34 = vadd.f32 %v4585_v51, %v2361_v22  ;;  %v2111_v36 = vrot.slane %v2110_v24, 2  ;;  %v2119_v37 = vmax.f32 %v2117_v25, %v2118_v61 }
 0x254   : > { %v2101_v35 = vmax.f32 %v2099_v15, %v2100_v23  ;;  %v3473_v38 = vpop.f32.mrb[54].mxu0  ;;  %v3553_v39 = vpop.f32.mrb[38].mxu1  ;;  %v2756_v40 = vsel %vm2735_vm3, %v2755_v28, %v2646_v42  ;;  %v2371_v41 = vrot.slane %v2370_v29, 2  ;;  %v2131_v44 = vsel %vm1958_vm2, %v3472_v26, -inf }
 0x255   : > { %v2379_v43 = vmax.f32 %v2377_v31, %v2378_v3  ;;  %v1402_v45 = vpop.f32.mrb[55].mxu0  ;;  %v1722_v46 = vpop.f32.mrb[39].mxu1  ;;  %v2668_v47 = vmax.f32 %v2620_v34, 0.0  ;;  %v2112_v49 = vmax.f32 %v2110_v24, %v2111_v36  ;;  %v2121_v50 = vmax.f32 %v2119_v37, %v2120_v17 }
 0x256   : > { %v2600_v48 = vadd.f32 %v4585_v51, %v2101_v35  ;;  %v2372_v52 = vmax.f32 %v2370_v29, %v2371_v41  ;;  %v2391_v54 = vsel %vm1958_vm2, %v3552_v27, -inf  ;;  %v2128_v55 = vsel %vm1958_vm2, %v1399_v32, -inf }
 0x257   : > { %v2381_v53 = vmax.f32 %v2379_v43, %v2380_v30  ;;  %v2793_v56 = vrot.slane %v2668_v47, 2  ;;  %v2113_v42 = vrot.slane %v2112_v49, 1  ;;  %v2122_v58 = vrot.slane %v2121_v50, 4 }
 0x258   : > { %v2648_v57 = vmax.f32 %v2600_v48, 0.0  ;;  %v2373_v59 = vrot.slane %v2372_v52, 1  ;;  %v2388_v61 = vsel %vm1958_vm2, %v1719_v33, -inf  ;;  %v2133_v62 = vsel %vm1958_vm2, %v3473_v38, -inf }
 0x259   : > { %v2382_v60 = vrot.slane %v2381_v53, 4  ;;  %v2794_v63 = vsel %vm2750_vm8, %v2793_v56, %v2792_v10  ;;  %v2114_v1 = vmax.f32 %v2112_v49, %v2113_v42  ;;  %v2123_v2 = vmax.f32 %v2121_v50, %v2122_v58 }
 0x25a   : > { %v2757_v0 = vrot.slane %v2648_v57, 6  ;;  %v3476_v3 = vpop.f32.mrb[56].mxu0  ;;  %v3556_v4 = vpop.f32.mrb[40].mxu1  ;;  %v2374_v5 = vmax.f32 %v2372_v52, %v2373_v59  ;;  %v2129_v7 = vsel %vm1958_vm2, %v1402_v45, -inf  ;;  %v2389_v8 = vsel %vm1958_vm2, %v1722_v46, -inf }
 0x25b   : > { %v2383_v6 = vmax.f32 %v2381_v53, %v2382_v60  ;;  %v1415_v9 = vpop.f32.mrb[57].mxu0  ;;  %v1735_v11 = vpop.f32.mrb[41].mxu1  ;;  %v2601_v13 = vadd.f32 %v4585_v51, %v2114_v1  ;;  %v2124_v14 = vrot.slane %v2123_v2, 2  ;;  %v2130_v15 = vmax.f32 %v2128_v55, %v2129_v7 }
 0x25c   : > { %v2758_v12 = vsel %vm2738_vm4, %v2757_v0, %v2756_v40  ;;  %v3477_v10 = vpop.f32.mrb[58].mxu0  ;;  %v3557_v16 = vpop.f32.mrb[42].mxu1  ;;  %v2621_v17 = vadd.f32 %v4585_v51, %v2374_v5  ;;  %v2393_v19 = vsel %vm1958_vm2, %v3553_v39, -inf  ;;  %v2390_v20 = vmax.f32 %v2388_v61, %v2389_v8 }
 0x25d   : > { %v2384_v18 = vrot.slane %v2383_v6, 2  ;;  %v1418_v21 = vpop.f32.mrb[59].mxu0  ;;  %v1738_v22 = vpop.f32.mrb[43].mxu1  ;;  %v2649_v23 = vmax.f32 %v2601_v13, 0.0  ;;  %v2125_v24 = vmax.f32 %v2123_v2, %v2124_v14  ;;  %v2132_v25 = vmax.f32 %v2130_v15, %v2131_v44 }
 0x25e   : > { %v2144_v26 = vsel %vm1958_vm2, %v3476_v3, -inf  ;;  %v2669_v27 = vmax.f32 %v2621_v17, 0.0  ;;  %v2392_v29 = vmax.f32 %v2390_v20, %v2391_v54  ;;  %v2404_v30 = vsel %vm1958_vm2, %v3556_v4, -inf }
 0x25f   : > { %v2385_v28 = vmax.f32 %v2383_v6, %v2384_v18  ;;  %v2759_v31 = vrot.slane %v2649_v23, 5  ;;  %v2126_v32 = vrot.slane %v2125_v24, 1  ;;  %v2134_v33 = vmax.f32 %v2132_v25, %v2133_v62 }
 0x260   : > { %v2141_v34 = vsel %vm1958_vm2, %v1415_v9, -inf  ;;  %v2795_v35 = vrot.slane %v2669_v27, 1  ;;  %v2394_v37 = vmax.f32 %v2392_v29, %v2393_v19  ;;  %v2401_v38 = vsel %vm1958_vm2, %v1735_v11, -inf }
 0x261   : > { %v2386_v36 = vrot.slane %v2385_v28, 1  ;;  %v2760_v39 = vsel %vm2741_vm5, %v2759_v31, %v2758_v12  ;;  %v2127_v40 = vmax.f32 %v2125_v24, %v2126_v32  ;;  %v2135_v41 = vrot.slane %v2134_v33, 4 }
 0x262   : > { %v2146_v43 = vsel %vm1958_vm2, %v3477_v10, -inf  ;;  %v3480_v44 = vpop.f32.mrb[60].mxu0  ;;  %v3560_v45 = vpop.f32.mrb[44].mxu1  ;;  %v2796_v46 = vsel %vm2753_vm9, %v2795_v35, %v2794_v63  ;;  %v2395_v48 = vrot.slane %v2394_v37, 4  ;;  %v2142_v49 = vsel %vm1958_vm2, %v1418_v21, -inf }
 0x263   : > { %v2387_v47 = vmax.f32 %v2385_v28, %v2386_v36  ;;  %v1431_v50 = vpop.f32.mrb[61].mxu0  ;;  %v1751_v52 = vpop.f32.mrb[45].mxu1  ;;  %2834 = vst.msk [vmem:[%s4674_s12 + $0x18] sm:$0xff] %vm1958_vm2, %v2796_v46  ;;  %v2602_v53 = vadd.f32 %v4585_v51, %v2127_v40  ;;  %v2136_v54 = vmax.f32 %v2134_v33, %v2135_v41  ;;  %v2143_v55 = vmax.f32 %v2141_v34, %v2142_v49 }
 0x264   : > { %v2402_v56 = vsel %vm1958_vm2, %v1738_v22, -inf  ;;  %v3481_v57 = vpop.f32.mrb[62].mxu0  ;;  %v3561_v42 = vpop.f32.mrb[46].mxu1  ;;  %v2396_v59 = vmax.f32 %v2394_v37, %v2395_v48  ;;  %v2406_v60 = vsel %vm1958_vm2, %v3557_v16, -inf  ;;  %v2157_v3 = vsel %vm1958_vm2, %v3480_v44, -inf }
 0x265   : > { %v4734_v58 = vadd.f32 %v4585_v51, %v2387_v47  ;;  %v2403_v61 = vmax.f32 %v2401_v38, %v2402_v56  ;;  %v1434_v62 = vpop.f32.mrb[63].mxu0  ;;  %v1754_v63 = vpop.f32.mrb[47].mxu1  ;;  %v2650_v0 = vmax.f32 %v2602_v53, 0.0  ;;  %v2137_v1 = vrot.slane %v2136_v54, 2 }
 0x266   : > { %v2145_v2 = vmax.f32 %v2143_v55, %v2144_v26  ;;  %v2397_v5 = vrot.slane %v2396_v59, 2  ;;  %v2417_v7 = vsel %vm1958_vm2, %v3560_v45, -inf  ;;  %v2154_v12 = vsel %vm1958_vm2, %v1431_v50, -inf }
 0x267   : > { %v2670_v4 = vmax.f32 %v4734_v58, 0.0  ;;  %v2405_v6 = vmax.f32 %v2403_v61, %v2404_v30  ;;  %v2761_v8 = vrot.slane %v2650_v0, 4  ;;  %v2138_v9 = vmax.f32 %v2136_v54, %v2137_v1 }
 0x268   : > { %v2147_v11 = vmax.f32 %v2145_v2, %v2146_v43  ;;  %v2398_v13 = vmax.f32 %v2396_v59, %v2397_v5  ;;  %v2414_v15 = vsel %vm1958_vm2, %v1751_v52, -inf  ;;  %v2159_v10 = vsel %vm1958_vm2, %v3481_v57, -inf }
 0x269   : > { %v2407_v14 = vmax.f32 %v2405_v6, %v2406_v60  ;;  %v2762_v16 = vsel %vm2744_vm6, %v2761_v8, %v2760_v39  ;;  %v2139_v17 = vrot.slane %v2138_v9, 1  ;;  %v2155_v19 = vsel %vm1958_vm2, %v1434_v62, -inf }
 0x26a   : > { %v2148_v18 = vrot.slane %v2147_v11, 4  ;;  %v3564_v20 = vpop.f32.mrb[48].mxu1  ;;  %v3484_v21 = vpop.f32.mrb[64].mxu0  ;;  %v2399_v22 = vrot.slane %v2398_v13, 1  ;;  %v2156_v24 = vmax.f32 %v2154_v12, %v2155_v19  ;;  %v2415_v25 = vsel %vm1958_vm2, %v1754_v63, -inf }
 0x26b   : > { %v2408_v23 = vrot.slane %v2407_v14, 4  ;;  %v1767_v26 = vpop.f32.mrb[49].mxu1  ;;  %v1447_v27 = vpop.f32.mrb[65].mxu0  ;;  %v2140_v28 = vmax.f32 %v2138_v9, %v2139_v17  ;;  %v2419_v30 = vsel %vm1958_vm2, %v3561_v42, -inf  ;;  %v2416_v31 = vmax.f32 %v2414_v15, %v2415_v25  ;;  %v4766_v19 = vld [vmem:[%s4968_s2] ss:$0 sm:$0xff] }
 0x26c   : > { %v2149_v29 = vmax.f32 %v2147_v11, %v2148_v18  ;;  %v3565_v32 = vpop.f32.mrb[50].mxu1  ;;  %v4747_v33 = vpop.f32.mrb[66].mxu0  ;;  %v2400_v34 = vmax.f32 %v2398_v13, %v2399_v22  ;;  %v2158_v36 = vmax.f32 %v2156_v24, %v2157_v3  ;;  %v2430_v37 = vsel %vm1958_vm2, %v3564_v20, -inf }
 0x26d   : > { %v2409_v35 = vmax.f32 %v2407_v14, %v2408_v23  ;;  %v1770_v38 = vpop.f32.mrb[51].mxu1  ;;  %v1450_v39 = vpop.f32.mrb[67].mxu0  ;;  %v2603_v40 = vadd.f32 %v4585_v51, %v2140_v28  ;;  %v2418_v43 = vmax.f32 %v2416_v31, %v2417_v7  ;;  %v2427_v44 = vsel %vm1958_vm2, %v1767_v26, -inf }
 0x26e   : > { %v2150_v41 = vrot.slane %v2149_v29, 2  ;;  %v2623_v45 = vadd.f32 %v4585_v51, %v2400_v34  ;;  %v2160_v47 = vmax.f32 %v2158_v36, %v2159_v10  ;;  %v2428_v48 = vsel %vm1958_vm2, %v1770_v38, -inf }
 0x26f   : > { %v2410_v46 = vrot.slane %v2409_v35, 2  ;;  %v2651_v49 = vmax.f32 %v2603_v40, 0.0  ;;  %v2420_v52 = vmax.f32 %v2418_v43, %v2419_v30  ;;  %v2429_v53 = vmax.f32 %v2427_v44, %v2428_v48 }
 0x270   : > { %v2151_v50 = vmax.f32 %v2149_v29, %v2150_v41  ;;  %v2671_v54 = vmax.f32 %v2623_v45, 0.0  ;;  %v2161_v56 = vrot.slane %v2160_v47, 4  ;;  %v2432_v57 = vsel %vm1958_vm2, %v3565_v32, -inf }
 0x271   : > { %v2411_v55 = vmax.f32 %v2409_v35, %v2410_v46  ;;  %v2763_v42 = vrot.slane %v2651_v49, 3  ;;  %v2421_v60 = vrot.slane %v2420_v52, 4  ;;  %v2431_v61 = vmax.f32 %v2429_v53, %v2430_v37 }
 0x272   : > { %v2152_v59 = vrot.slane %v2151_v50, 1  ;;  %v3568_v62 = vpop.f32.mrb[52].mxu1  ;;  %v4755_v63 = vpop.f32.mrb[68].mxu0  ;;  %v2797_v51 = vrot.slane %v2671_v54, 7  ;;  %v2162_v1 = vmax.f32 %v2160_v47, %v2161_v56  ;;  %v2170_v3 = vsel %vm1958_vm2, %v3484_v21, -inf }
 0x273   : > { %v2412_v0 = vrot.slane %v2411_v55, 1  ;;  %v1783_v2 = vpop.f32.mrb[53].mxu1  ;;  %v1463_v5 = vpop.f32.mrb[69].mxu0  ;;  %v2764_v6 = vsel %vm2747_vm7, %v2763_v42, %v2762_v16  ;;  %v2422_v8 = vmax.f32 %v2420_v52, %v2421_v60  ;;  %v2433_v9 = vmax.f32 %v2431_v61, %v2432_v57 }
 0x274   : > { %v2153_v7 = vmax.f32 %v2151_v50, %v2152_v59  ;;  %v3569_v11 = vpop.f32.mrb[54].mxu1  ;;  %v3489_v12 = vpop.f32.mrb[70].mxu0  ;;  %v2798_v13 = vsel %vm2735_vm3, %v2797_v51, %v2670_v4  ;;  %v2163_v15 = vrot.slane %v2162_v1, 2  ;;  %v2443_v10 = vsel %vm1958_vm2, %v3568_v62, -inf }
 0x275   : > { %v2413_v14 = vmax.f32 %v2411_v55, %v2412_v0  ;;  %v1786_v17 = vpop.f32.mrb[55].mxu1  ;;  %v1466_v18 = vpop.f32.mrb[71].mxu0  ;;  %v2423_v20 = vrot.slane %v2422_v8, 2  ;;  %v2434_v21 = vrot.slane %v2433_v9, 4  ;;  %v2440_v22 = vsel %vm1958_vm2, %v1783_v2, -inf }
 0x276   : > { %v2604_v16 = vadd.f32 %v4766_v19, %v2153_v7  ;;  %v2164_v4 = vmax.f32 %v2162_v1, %v2163_v15  ;;  %v2167_v23 = vsel %vm1958_vm2, %v1447_v27, -inf  ;;  %v2441_v24 = vsel %vm1958_vm2, %v1786_v17, -inf }
 0x277   : > { %v2624_v58 = vadd.f32 %v4766_v19, %v2413_v14  ;;  %v2424_v26 = vmax.f32 %v2422_v8, %v2423_v20  ;;  %v2435_v28 = vmax.f32 %v2433_v9, %v2434_v21  ;;  %v2442_v29 = vmax.f32 %v2440_v22, %v2441_v24 }
 0x278   : > { %v2652_v25 = vmax.f32 %v2604_v16, 0.0  ;;  %v2165_v31 = vrot.slane %v2164_v4, 1  ;;  %v2445_v32 = vsel %vm1958_vm2, %v3569_v11, -inf  ;;  %v2168_v34 = vsel %vm1958_vm2, %v1450_v39, -inf }
 0x279   : > { %v2672_v30 = vmax.f32 %v2624_v58, 0.0  ;;  %v2425_v36 = vrot.slane %v2424_v26, 1  ;;  %v2436_v37 = vrot.slane %v2435_v28, 2  ;;  %v2444_v38 = vmax.f32 %v2442_v29, %v2443_v10 }
 0x27a   : > { %v2765_v35 = vrot.slane %v2652_v25, 2  ;;  %v3572_v40 = vpop.f32.mrb[56].mxu1  ;;  %v3492_v41 = vpop.f32.mrb[72].mxu0  ;;  %v2166_v27 = vmax.f32 %v2164_v4, %v2165_v31  ;;  %v2172_v44 = vsel %vm1958_vm2, %v4747_v33, -inf  ;;  %v2169_v45 = vmax.f32 %v2167_v23, %v2168_v34 }
 0x27b   : > { %v2799_v43 = vrot.slane %v2672_v30, 6  ;;  %v1799_v46 = vpop.f32.mrb[57].mxu1  ;;  %v1479_v47 = vpop.f32.mrb[73].mxu0  ;;  %v2426_v49 = vmax.f32 %v2424_v26, %v2425_v36  ;;  %v2437_v50 = vmax.f32 %v2435_v28, %v2436_v37  ;;  %v2446_v52 = vmax.f32 %v2444_v38, %v2445_v32 }
 0x27c   : > { %v2766_v48 = vsel %vm2750_vm8, %v2765_v35, %v2764_v6  ;;  %v3573_v39 = vpop.f32.mrb[58].mxu1  ;;  %v3493_v53 = vpop.f32.mrb[74].mxu0  ;;  %v2605_v55 = vadd.f32 %v4766_v19, %v2166_v27  ;;  %v2171_v56 = vmax.f32 %v2169_v45, %v2170_v3  ;;  %v2180_v57 = vsel %vm1958_vm2, %v1463_v5, -inf }
 0x27d   : > { %v2800_v54 = vsel %vm2738_vm4, %v2799_v43, %v2798_v13  ;;  %v1802_v42 = vpop.f32.mrb[59].mxu1  ;;  %v1482_v59 = vpop.f32.mrb[75].mxu0  ;;  %v2625_v33 = vadd.f32 %v4766_v19, %v2426_v49  ;;  %v2438_v60 = vrot.slane %v2437_v50, 1  ;;  %v2447_v61 = vrot.slane %v2446_v52, 4 }
 0x27e   : > { %v2653_v62 = vmax.f32 %v2605_v55, 0.0  ;;  %v2173_v51 = vmax.f32 %v2171_v56, %v2172_v44  ;;  %v2183_v0 = vsel %vm1958_vm2, %v4755_v63, -inf  ;;  %v2181_v1 = vsel %vm1958_vm2, %v1466_v18, -inf }
 0x27f   : > { %v2673_v2 = vmax.f32 %v2625_v33, 0.0  ;;  %v2439_v6 = vmax.f32 %v2437_v50, %v2438_v60  ;;  %v2448_v7 = vmax.f32 %v2446_v52, %v2447_v61  ;;  %v2182_v8 = vmax.f32 %v2180_v57, %v2181_v1 }
 0x280   : > { %v2767_v3 = vrot.slane %v2653_v62, 1  ;;  %v2174_v5 = vrot.slane %v2173_v51, 4  ;;  %v2185_v9 = vsel %vm1958_vm2, %v3489_v12, -inf  ;;  %v2456_v11 = vsel %vm1958_vm2, %v3572_v40, -inf }
 0x281   : > { %v2801_v13 = vrot.slane %v2673_v2, 5  ;;  %v2626_v14 = vadd.f32 %v4766_v19, %v2439_v6  ;;  %v2449_v15 = vrot.slane %v2448_v7, 2  ;;  %v2184_v10 = vmax.f32 %v2182_v8, %v2183_v0 }
 0x282   : > { %v3496_v17 = vpop.f32.mrb[76].mxu0  ;;  %v3576_v63 = vpop.f32.mrb[60].mxu1  ;;  %v2768_v18 = vsel %vm2753_vm9, %v2767_v3, %v2766_v48  ;;  %v2175_v16 = vmax.f32 %v2173_v51, %v2174_v5  ;;  %v2453_v20 = vsel %vm1958_vm2, %v1799_v46, -inf  ;;  %v2193_v21 = vsel %vm1958_vm2, %v1479_v47, -inf }
 0x283   : > { %v1495_v22 = vpop.f32.mrb[77].mxu0  ;;  %v1815_v58 = vpop.f32.mrb[61].mxu1  ;;  %2832 = vst.msk [vmem:[%s4674_s12 + $0x8] sm:$0xff] %vm1958_vm2, %v2768_v18  ;;  %v2802_v12 = vsel %vm2741_vm5, %v2801_v13, %v2800_v54  ;;  %v2674_v4 = vmax.f32 %v2626_v14, 0.0  ;;  %v2450_v23 = vmax.f32 %v2448_v7, %v2449_v15  ;;  %v2186_v24 = vmax.f32 %v2184_v10, %v2185_v9 }
 0x284   : > { %v3497_v25 = vpop.f32.mrb[78].mxu0  ;;  %v3577_v26 = vpop.f32.mrb[62].mxu1  ;;  %v2176_v28 = vrot.slane %v2175_v16, 2  ;;  %v2196_v29 = vsel %vm1958_vm2, %v3492_v41, -inf  ;;  %v2454_v30 = vsel %vm1958_vm2, %v1802_v42, -inf  ;;  %v2194_v31 = vsel %vm1958_vm2, %v1482_v59, -inf }
 0x285   : > { %v1498_v32 = vpop.f32.mrb[79].mxu0  ;;  %v1818_v34 = vpop.f32.mrb[63].mxu1  ;;  %v2803_v35 = vrot.slane %v2674_v4, 4  ;;  %v2451_v36 = vrot.slane %v2450_v23, 1  ;;  %v2187_v37 = vrot.slane %v2186_v24, 4  ;;  %v2455_v38 = vmax.f32 %v2453_v20, %v2454_v30 }
 0x286   : > { %v2177_v40 = vmax.f32 %v2175_v16, %v2176_v28  ;;  %v2458_v43 = vsel %vm1958_vm2, %v3573_v39, -inf  ;;  %v2198_v27 = vsel %vm1958_vm2, %v3493_v53, -inf  ;;  %v2195_v44 = vmax.f32 %v2193_v21, %v2194_v31 }
 0x287   : > { %v2804_v45 = vsel %vm2744_vm6, %v2803_v35, %v2802_v12  ;;  %v2452_v46 = vmax.f32 %v2450_v23, %v2451_v36  ;;  %v2188_v41 = vmax.f32 %v2186_v24, %v2187_v37  ;;  %v2457_v47 = vmax.f32 %v2455_v38, %v2456_v11 }
 0x288   : > { %v2178_v48 = vrot.slane %v2177_v40, 1  ;;  %v2197_v49 = vmax.f32 %v2195_v44, %v2196_v29  ;;  %v2209_v50 = vsel %vm1958_vm2, %v3496_v17, -inf  ;;  %v2206_v52 = vsel %vm1958_vm2, %v1495_v22, -inf }
 0x289   : > { %v2627_v54 = vadd.f32 %v4766_v19, %v2452_v46  ;;  %v2189_v55 = vrot.slane %v2188_v41, 2  ;;  %v2459_v56 = vmax.f32 %v2457_v47, %v2458_v43  ;;  %v2469_v39 = vsel %vm1958_vm2, %v3576_v63, -inf }
 0x28a   : > { %v3500_v57 = vpop.f32.mrb[80].mxu0  ;;  %v3580_v53 = vpop.f32.mrb[64].mxu1  ;;  %v2179_v42 = vmax.f32 %v2177_v40, %v2178_v48  ;;  %v2199_v59 = vmax.f32 %v2197_v49, %v2198_v27  ;;  %v2466_v33 = vsel %vm1958_vm2, %v1815_v58, -inf  ;;  %v2207_v60 = vsel %vm1958_vm2, %v1498_v32, -inf }
 0x28b   : > { %v1511_v61 = vpop.f32.mrb[81].mxu0  ;;  %v1831_v62 = vpop.f32.mrb[65].mxu1  ;;  %v2675_v51 = vmax.f32 %v2627_v54, 0.0  ;;  %v2190_v0 = vmax.f32 %v2188_v41, %v2189_v55  ;;  %v2460_v1 = vrot.slane %v2459_v56, 4  ;;  %v2208_v2 = vmax.f32 %v2206_v52, %v2207_v60 }
 0x28c   : > { %v3501_v6 = vpop.f32.mrb[82].mxu0  ;;  %v3581_v7 = vpop.f32.mrb[66].mxu1  ;;  %v2606_v8 = vadd.f32 %v4766_v19, %v2179_v42  ;;  %v2200_v3 = vrot.slane %v2199_v59, 4  ;;  %v2211_v5 = vsel %vm1958_vm2, %v3497_v25, -inf  ;;  %v2467_v9 = vsel %vm1958_vm2, %v1818_v34, -inf }
 0x28d   : > { %v1514_v11 = vpop.f32.mrb[83].mxu0  ;;  %v1834_v13 = vpop.f32.mrb[67].mxu1  ;;  %v2805_v14 = vrot.slane %v2675_v51, 3  ;;  %v2191_v15 = vrot.slane %v2190_v0, 1  ;;  %v2461_v10 = vmax.f32 %v2459_v56, %v2460_v1  ;;  %v2210_v17 = vmax.f32 %v2208_v2, %v2209_v50 }
 0x28e   : > { %v2201_v63 = vmax.f32 %v2199_v59, %v2200_v3  ;;  %v2471_v18 = vsel %vm1958_vm2, %v3577_v26, -inf  ;;  %v2468_v16 = vmax.f32 %v2466_v33, %v2467_v9  ;;  %v2222_v20 = vsel %vm1958_vm2, %v3500_v57, -inf }
 0x28f   : > { %v4812_v21 = vsel %vm2747_vm7, %v2805_v14, %v2804_v45  ;;  %v2192_v22 = vmax.f32 %v2190_v0, %v2191_v15  ;;  %v2462_v58 = vrot.slane %v2461_v10, 2  ;;  %v2212_v12 = vmax.f32 %v2210_v17, %v2211_v5 }
 0x290   : > { %v2654_v4 = vmax.f32 %v2606_v8, 0.0  ;;  %v2202_v23 = vrot.slane %v2201_v63, 2  ;;  %v2470_v24 = vmax.f32 %v2468_v16, %v2469_v39  ;;  %v2219_v25 = vsel %vm1958_vm2, %v1511_v61, -inf }
 0x291   : > { %v2607_v28 = vadd.f32 %v4766_v19, %v2192_v22  ;;  %v2463_v29 = vmax.f32 %v2461_v10, %v2462_v58  ;;  %v2213_v30 = vrot.slane %v2212_v12, 4  ;;  %v2482_v26 = vsel %vm1958_vm2, %v3580_v53, -inf }
 0x292   : > { %v3504_v31 = vpop.f32.mrb[84].mxu0  ;;  %v4817_v32 = vpop.f32.mrb[68].mxu1  ;;  %v2203_v34 = vmax.f32 %v2201_v63, %v2202_v23  ;;  %v2472_v35 = vmax.f32 %v2470_v24, %v2471_v18  ;;  %v2479_v36 = vsel %vm1958_vm2, %v1831_v62, -inf  ;;  %v2220_v37 = vsel %vm1958_vm2, %v1514_v11, -inf }
 0x293   : > { %v1527_v38 = vpop.f32.mrb[85].mxu0  ;;  %v1847_v40 = vpop.f32.mrb[69].mxu1  ;;  %v2655_v43 = vmax.f32 %v2607_v28, 0.0  ;;  %v2464_v27 = vrot.slane %v2463_v29, 1  ;;  %v2214_v44 = vmax.f32 %v2212_v12, %v2213_v30  ;;  %v2221_v45 = vmax.f32 %v2219_v25, %v2220_v37 }
 0x294   : > { %v3505_v46 = vpop.f32.mrb[86].mxu0  ;;  %v3585_v41 = vpop.f32.mrb[70].mxu1  ;;  %v2204_v47 = vrot.slane %v2203_v34, 1  ;;  %v2473_v48 = vrot.slane %v2472_v35, 4  ;;  %v2224_v49 = vsel %vm1958_vm2, %v3501_v6, -inf  ;;  %v2480_v50 = vsel %vm1958_vm2, %v1834_v13, -inf }
 0x295   : > { %v1530_v52 = vpop.f32.mrb[87].mxu0  ;;  %v1850_v54 = vpop.f32.mrb[71].mxu1  ;;  %v2769_v55 = vrot.slane %v2655_v43, 7  ;;  %v2465_v56 = vmax.f32 %v2463_v29, %v2464_v27  ;;  %v2215_v39 = vrot.slane %v2214_v44, 2  ;;  %v2223_v57 = vmax.f32 %v2221_v45, %v2222_v20 }
 0x296   : > { %v2205_v53 = vmax.f32 %v2203_v34, %v2204_v47  ;;  %v2474_v42 = vmax.f32 %v2472_v35, %v2473_v48  ;;  %v2484_v59 = vsel %vm1958_vm2, %v3581_v7, -inf  ;;  %v2481_v33 = vmax.f32 %v2479_v36, %v2480_v50 }
 0x297   : > { %v2770_v60 = vsel %vm2735_vm3, %v2769_v55, %v2654_v4  ;;  %v2628_v61 = vadd.f32 %v4766_v19, %v2465_v56  ;;  %v2216_v62 = vmax.f32 %v2214_v44, %v2215_v39  ;;  %v2225_v51 = vmax.f32 %v2223_v57, %v2224_v49 }
 0x298   : > { %v2608_v0 = vadd.f32 %v4766_v19, %v2205_v53  ;;  %v2475_v1 = vrot.slane %v2474_v42, 2  ;;  %v2483_v2 = vmax.f32 %v2481_v33, %v2482_v26  ;;  %v2235_v6 = vsel %vm1958_vm2, %v3504_v31, -inf }
 0x299   : > { %v2676_v8 = vmax.f32 %v2628_v61, 0.0  ;;  %v2217_v3 = vrot.slane %v2216_v62, 1  ;;  %v2226_v5 = vrot.slane %v2225_v51, 4  ;;  %v2232_v9 = vsel %vm1958_vm2, %v1527_v38, -inf }
 0x29a   : > { %v3508_v11 = vpop.f32.mrb[88].mxu0  ;;  %v4829_v7 = vpop.f32.mrb[72].mxu1  ;;  %v2656_v13 = vmax.f32 %v2608_v0, 0.0  ;;  %v2476_v14 = vmax.f32 %v2474_v42, %v2475_v1  ;;  %v2485_v15 = vmax.f32 %v2483_v2, %v2484_v59  ;;  %v2492_v10 = vsel %vm1958_vm2, %v1847_v40, -inf }
 0x29b   : > { %v1543_v17 = vpop.f32.mrb[89].mxu0  ;;  %v1863_v63 = vpop.f32.mrb[73].mxu1  ;;  %v2807_v18 = vrot.slane %v2676_v8, 2  ;;  %v2218_v16 = vmax.f32 %v2216_v62, %v2217_v3  ;;  %v2227_v20 = vmax.f32 %v2225_v51, %v2226_v5  ;;  %v2237_v22 = vsel %vm1958_vm2, %v3505_v46, -inf }
 0x29c   : > { %v3509_v58 = vpop.f32.mrb[90].mxu0  ;;  %v3589_v12 = vpop.f32.mrb[74].mxu1  ;;  %v2771_v4 = vrot.slane %v2656_v13, 6  ;;  %v2477_v23 = vrot.slane %v2476_v14, 1  ;;  %v2486_v24 = vrot.slane %v2485_v15, 4  ;;  %v2233_v25 = vsel %vm1958_vm2, %v1530_v52, -inf }
 0x29d   : > { %v1546_v28 = vpop.f32.mrb[91].mxu0  ;;  %v1866_v29 = vpop.f32.mrb[75].mxu1  ;;  %v2808_v30 = vsel %vm2750_vm8, %v2807_v18, %v4812_v21  ;;  %v2609_v26 = vadd.f32 %v4766_v19, %v2218_v16  ;;  %v2228_v31 = vrot.slane %v2227_v20, 2  ;;  %v2234_v34 = vmax.f32 %v2232_v9, %v2233_v25 }
 0x29e   : > { %v2772_v35 = vsel %vm2738_vm4, %v2771_v4, %v2770_v60  ;;  %v2478_v36 = vmax.f32 %v2476_v14, %v2477_v23  ;;  %v2487_v37 = vmax.f32 %v2485_v15, %v2486_v24  ;;  %v2493_v38 = vsel %vm1958_vm2, %v1850_v54, -inf }
 0x29f   : > { %v2657_v40 = vmax.f32 %v2609_v26, 0.0  ;;  %v2229_v43 = vmax.f32 %v2227_v20, %v2228_v31  ;;  %v2236_v27 = vmax.f32 %v2234_v34, %v2235_v6  ;;  %v2494_v44 = vmax.f32 %v2492_v10, %v2493_v38 }
 0x2a0   : > { %v2629_v45 = vadd.f32 %v4766_v19, %v2478_v36  ;;  %v2488_v46 = vrot.slane %v2487_v37, 2  ;;  %v2495_v21 = vsel %vm1958_vm2, %v4817_v32, -inf  ;;  %v2497_v47 = vsel %vm1958_vm2, %v3585_v41, -inf }
 0x2a1   : > { %v2773_v48 = vrot.slane %v2657_v40, 5  ;;  %v2230_v49 = vrot.slane %v2229_v43, 1  ;;  %v2238_v50 = vmax.f32 %v2236_v27, %v2237_v22  ;;  %v2496_v52 = vmax.f32 %v2494_v44, %v2495_v21 }
 0x2a2   : > { %v3512_v55 = vpop.f32.mrb[92].mxu0  ;;  %v3592_v56 = vpop.f32.mrb[76].mxu1  ;;  %v2677_v39 = vmax.f32 %v2629_v45, 0.0  ;;  %v2489_v54 = vmax.f32 %v2487_v37, %v2488_v46  ;;  %v2248_v57 = vsel %vm1958_vm2, %v3508_v11, -inf  ;;  %v2245_v53 = vsel %vm1958_vm2, %v1543_v17, -inf }
 0x2a3   : > { %v1559_v42 = vpop.f32.mrb[93].mxu0  ;;  %v1879_v59 = vpop.f32.mrb[77].mxu1  ;;  %v2774_v33 = vsel %vm2741_vm5, %v2773_v48, %v2772_v35  ;;  %v2231_v60 = vmax.f32 %v2229_v43, %v2230_v49  ;;  %v2239_v32 = vrot.slane %v2238_v50, 4  ;;  %v2498_v61 = vmax.f32 %v2496_v52, %v2497_v47 }
 0x2a4   : > { %v3513_v41 = vpop.f32.mrb[94].mxu0  ;;  %v3593_v62 = vpop.f32.mrb[78].mxu1  ;;  %v2809_v51 = vrot.slane %v2677_v39, 1  ;;  %v2490_v0 = vrot.slane %v2489_v54, 1  ;;  %v2505_v1 = vsel %vm1958_vm2, %v1863_v63, -inf  ;;  %v2250_v2 = vsel %vm1958_vm2, %v3509_v58, -inf }
 0x2a5   : > { %v1562_v6 = vpop.f32.mrb[95].mxu0  ;;  %v1882_v8 = vpop.f32.mrb[79].mxu1  ;;  %v2610_v3 = vadd.f32 %v4766_v19, %v2231_v60  ;;  %v2240_v5 = vmax.f32 %v2238_v50, %v2239_v32  ;;  %v2499_v9 = vrot.slane %v2498_v61, 4  ;;  %v2246_v11 = vsel %vm1958_vm2, %v1546_v28, -inf }
 0x2a6   : > { %v2810_v13 = vsel %vm2753_vm9, %v2809_v51, %v2808_v30  ;;  %v2491_v14 = vmax.f32 %v2489_v54, %v2490_v0  ;;  %v2247_v15 = vmax.f32 %v2245_v53, %v2246_v11  ;;  %v2506_v10 = vsel %vm1958_vm2, %v1866_v29, -inf }
 0x2a7   : > { %2835 = vst.msk [vmem:[%s4674_s12 + $0x20] sm:$0xff] %vm1958_vm2, %v2810_v13  ;;  %v2658_v17 = vmax.f32 %v2610_v3, 0.0  ;;  %v2241_v63 = vrot.slane %v2240_v5, 2  ;;  %v2500_v18 = vmax.f32 %v2498_v61, %v2499_v9  ;;  %v2507_v16 = vmax.f32 %v2505_v1, %v2506_v10 }
 0x2a8   : > { %v4855_v20 = vadd.f32 %v4766_v19, %v2491_v14  ;;  %v2508_v22 = vsel %vm1958_vm2, %v4829_v7, -inf  ;;  %v2510_v58 = vsel %vm1958_vm2, %v3589_v12, -inf  ;;  %v2249_v4 = vmax.f32 %v2247_v15, %v2248_v57 }
 0x2a9   : > { %v2775_v23 = vrot.slane %v2658_v17, 4  ;;  %v2242_v24 = vmax.f32 %v2240_v5, %v2241_v63  ;;  %v2501_v25 = vrot.slane %v2500_v18, 2  ;;  %v2509_v28 = vmax.f32 %v2507_v16, %v2508_v22 }
 0x2aa   : > { %v3596_v29 = vpop.f32.mrb[80].mxu1  ;;  %v2251_v30 = vmax.f32 %v2249_v4, %v2250_v2  ;;  %v2261_v26 = vsel %vm1958_vm2, %v3512_v55, -inf  ;;  %v2521_v31 = vsel %vm1958_vm2, %v3592_v56, -inf  ;;  %v2258_v34 = vsel %vm1958_vm2, %v1559_v42, -inf }
 0x2ab   : > { %v1895_v35 = vpop.f32.mrb[81].mxu1  ;;  %v2776_v36 = vsel %vm2744_vm6, %v2775_v23, %v2774_v33  ;;  %v2243_v37 = vrot.slane %v2242_v24, 1  ;;  %v2502_v7 = vmax.f32 %v2500_v18, %v2501_v25  ;;  %v2511_v38 = vmax.f32 %v2509_v28, %v2510_v58 }
 0x2ac   : > { %v3597_v12 = vpop.f32.mrb[82].mxu1  ;;  %v2678_v40 = vmax.f32 %v4855_v20, 0.0  ;;  %v2252_v43 = vrot.slane %v2251_v30, 4  ;;  %v2518_v27 = vsel %vm1958_vm2, %v1879_v59, -inf  ;;  %v2259_v44 = vsel %vm1958_vm2, %v1562_v6, -inf }
 0x2ad   : > { %v1898_v45 = vpop.f32.mrb[83].mxu1  ;;  %v2244_v46 = vmax.f32 %v2242_v24, %v2243_v37  ;;  %v2503_v21 = vrot.slane %v2502_v7, 1  ;;  %v2512_v47 = vrot.slane %v2511_v38, 4  ;;  %v2260_v48 = vmax.f32 %v2258_v34, %v2259_v44 }
 0x2ae   : > { %v2253_v49 = vmax.f32 %v2251_v30, %v2252_v43  ;;  %v2263_v50 = vsel %vm1958_vm2, %v3513_v41, -inf  ;;  %v2523_v52 = vsel %vm1958_vm2, %v3593_v62, -inf  ;;  %v2519_v55 = vsel %vm1958_vm2, %v1882_v8, -inf }
 0x2af   : > { %v2611_v56 = vadd.f32 %v4766_v19, %v2244_v46  ;;  %v2504_v39 = vmax.f32 %v2502_v7, %v2503_v21  ;;  %v2513_v54 = vmax.f32 %v2511_v38, %v2512_v47  ;;  %v2262_v57 = vmax.f32 %v2260_v48, %v2261_v26 }
 0x2b0   : > { %v2254_v53 = vrot.slane %v2253_v49, 2  ;;  %v2520_v42 = vmax.f32 %v2518_v27, %v2519_v55  ;;  %v2531_v59 = vsel %vm1958_vm2, %v1895_v35, -inf  ;;  %v2532_v33 = vsel %vm1958_vm2, %v1898_v45, -inf }
 0x2b1   : > { %v2659_v60 = vmax.f32 %v2611_v56, 0.0  ;;  %v2631_v32 = vadd.f32 %v4766_v19, %v2504_v39  ;;  %v2514_v61 = vrot.slane %v2513_v54, 2  ;;  %v2264_v41 = vmax.f32 %v2262_v57, %v2263_v50 }
 0x2b2   : > { %v3600_v51 = vpop.f32.mrb[84].mxu1  ;;  %v2255_v62 = vmax.f32 %v2253_v49, %v2254_v53  ;;  %v2522_v0 = vmax.f32 %v2520_v42, %v2521_v31  ;;  %v2534_v1 = vsel %vm1958_vm2, %v3596_v29, -inf  ;;  %v2533_v2 = vmax.f32 %v2531_v59, %v2532_v33 }
 0x2b3   : > { %v1911_v6 = vpop.f32.mrb[85].mxu1  ;;  %v2777_v8 = vrot.slane %v2659_v60, 3  ;;  %v2679_v3 = vmax.f32 %v2631_v32, 0.0  ;;  %v2515_v5 = vmax.f32 %v2513_v54, %v2514_v61  ;;  %v2265_v9 = vrot.slane %v2264_v41, 4 }
 0x2b4   : > { %v3601_v11 = vpop.f32.mrb[86].mxu1  ;;  %v2256_v13 = vrot.slane %v2255_v62, 1  ;;  %v2524_v14 = vmax.f32 %v2522_v0, %v2523_v52  ;;  %v2536_v15 = vsel %vm1958_vm2, %v3597_v12, -inf  ;;  %v2535_v10 = vmax.f32 %v2533_v2, %v2534_v1 }
 0x2b5   : > { %v1914_v17 = vpop.f32.mrb[87].mxu1  ;;  %v2778_v63 = vsel %vm2747_vm7, %v2777_v8, %v2776_v36  ;;  %v2811_v18 = vrot.slane %v2679_v3, 7  ;;  %v2516_v16 = vrot.slane %v2515_v5, 1  ;;  %v2266_v20 = vmax.f32 %v2264_v41, %v2265_v9 }
 0x2b6   : > { %v2257_v22 = vmax.f32 %v2255_v62, %v2256_v13  ;;  %v2525_v58 = vrot.slane %v2524_v14, 4  ;;  %v2537_v4 = vmax.f32 %v2535_v10, %v2536_v15  ;;  %v2544_v23 = vsel %vm1958_vm2, %v1911_v6, -inf }
 0x2b7   : > { %v2812_v24 = vsel %vm2735_vm3, %v2811_v18, %v2678_v40  ;;  %v2517_v25 = vmax.f32 %v2515_v5, %v2516_v16  ;;  %v2267_v28 = vrot.slane %v2266_v20, 2  ;;  %v2545_v29 = vsel %vm1958_vm2, %v1914_v17, -inf }
 0x2b8   : > { %v2612_v30 = vadd.f32 %v4766_v19, %v2257_v22  ;;  %v2526_v26 = vmax.f32 %v2524_v14, %v2525_v58  ;;  %v2538_v31 = vrot.slane %v2537_v4, 4  ;;  %v2546_v34 = vmax.f32 %v2544_v23, %v2545_v29 }
 0x2b9   : > { %v2632_v35 = vadd.f32 %v4766_v19, %v2517_v25  ;;  %v2268_v36 = vmax.f32 %v2266_v20, %v2267_v28  ;;  %v2547_v37 = vsel %vm1958_vm2, %v3600_v51, -inf  ;;  %v2549_v46 = vsel %vm1958_vm2, %v3601_v11, -inf }
 0x2ba   : > { %v3604_v7 = vpop.f32.mrb[88].mxu1  ;;  %v2660_v38 = vmax.f32 %v2612_v30, 0.0  ;;  %v2527_v12 = vrot.slane %v2526_v26, 2  ;;  %v2539_v43 = vmax.f32 %v2537_v4, %v2538_v31  ;;  %v2548_v27 = vmax.f32 %v2546_v34, %v2547_v37 }
 0x2bb   : > { %v1927_v40 = vpop.f32.mrb[89].mxu1  ;;  %v2680_v44 = vmax.f32 %v2632_v35, 0.0  ;;  %v2269_v45 = vrot.slane %v2268_v36, 1  ;;  %v2560_v62 = vsel %vm1958_vm2, %v3604_v7, -inf }
 0x2bc   : > { %v3605_v21 = vpop.f32.mrb[90].mxu1  ;;  %v2779_v47 = vrot.slane %v2660_v38, 2  ;;  %v2528_v48 = vmax.f32 %v2526_v26, %v2527_v12  ;;  %v2540_v49 = vrot.slane %v2539_v43, 2  ;;  %v2550_v50 = vmax.f32 %v2548_v27, %v2549_v46 }
 0x2bd   : > { %v1930_v52 = vpop.f32.mrb[91].mxu1  ;;  %v2813_v55 = vrot.slane %v2680_v44, 6  ;;  %v2270_v56 = vmax.f32 %v2268_v36, %v2269_v45  ;;  %v2557_v39 = vsel %vm1958_vm2, %v1927_v40, -inf  ;;  %v2562_v5 = vsel %vm1958_vm2, %v3605_v21, -inf }
 0x2be   : > { %v2558_v54 = vsel %vm1958_vm2, %v1930_v52, -inf  ;;  %v2780_v57 = vsel %vm2750_vm8, %v2779_v47, %v2778_v63  ;;  %v2529_v53 = vrot.slane %v2528_v48, 1  ;;  %v2541_v42 = vmax.f32 %v2539_v43, %v2540_v49 }
 0x2bf   : > { %v2551_v59 = vrot.slane %v2550_v50, 4  ;;  %v2814_v33 = vsel %vm2738_vm4, %v2813_v55, %v2812_v24  ;;  %v2613_v60 = vadd.f32 %v4766_v19, %v2270_v56  ;;  %v2559_v32 = vmax.f32 %v2557_v39, %v2558_v54 }
 0x2c0   : > { %v2530_v61 = vmax.f32 %v2528_v48, %v2529_v53  ;;  %v2542_v41 = vrot.slane %v2541_v42, 1 }
 0x2c1   : > { %v2552_v51 = vmax.f32 %v2550_v50, %v2551_v59  ;;  %v2661_v0 = vmax.f32 %v2613_v60, 0.0  ;;  %v2561_v1 = vmax.f32 %v2559_v32, %v2560_v62 }
 0x2c2   : > { %v3608_v2 = vpop.f32.mrb[92].mxu1  ;;  %v2633_v6 = vadd.f32 %v4766_v19, %v2530_v61  ;;  %v2543_v8 = vmax.f32 %v2541_v42, %v2542_v41 }
 0x2c3   : > { %v2553_v3 = vrot.slane %v2552_v51, 2  ;;  %v1943_v9 = vpop.f32.mrb[93].mxu1  ;;  %v2781_v11 = vrot.slane %v2661_v0, 1  ;;  %v2563_v13 = vmax.f32 %v2561_v1, %v2562_v5  ;;  %v2573_v28 = vsel %vm1958_vm2, %v3608_v2, -inf }
 0x2c4   : > { %v3609_v14 = vpop.f32.mrb[94].mxu1  ;;  %v2681_v15 = vmax.f32 %v2633_v6, 0.0  ;;  %v2634_v10 = vadd.f32 %v4766_v19, %v2543_v8  ;;  %v2570_v20 = vsel %vm1958_vm2, %v1943_v9, -inf }
 0x2c5   : > { %v2554_v17 = vmax.f32 %v2552_v51, %v2553_v3  ;;  %v1946_v63 = vpop.f32.mrb[95].mxu1  ;;  %v2782_v18 = vsel %vm2753_vm9, %v2781_v11, %v2780_v57  ;;  %v2564_v16 = vrot.slane %v2563_v13, 4  ;;  %v2575_v35 = vsel %vm1958_vm2, %v3609_v14, -inf }
 0x2c6   : > { %v2571_v22 = vsel %vm1958_vm2, %v1946_v63, -inf  ;;  %2833 = vst.msk [vmem:[%s4674_s12 + $0x10] sm:$0xff] %vm1958_vm2, %v2782_v18  ;;  %v2815_v58 = vrot.slane %v2681_v15, 5  ;;  %v2682_v4 = vmax.f32 %v2634_v10, 0.0 }
 0x2c7   : > { %v2555_v23 = vrot.slane %v2554_v17, 1  ;;  %v2572_v24 = vmax.f32 %v2570_v20, %v2571_v22  ;;  %v2565_v25 = vmax.f32 %v2563_v13, %v2564_v16 }
 0x2c8   : > { %v2816_v29 = vsel %vm2741_vm5, %v2815_v58, %v2814_v33  ;;  %v2817_v30 = vrot.slane %v2682_v4, 4 }
 0x2c9   : > { %v2556_v26 = vmax.f32 %v2554_v17, %v2555_v23  ;;  %v2574_v31 = vmax.f32 %v2572_v24, %v2573_v28  ;;  %v2566_v34 = vrot.slane %v2565_v25, 2 }
 0x2ca   : > { %v2818_v36 = vsel %vm2744_vm6, %v2817_v30, %v2816_v29 }
 0x2cb   : > { %v2635_v37 = vadd.f32 %v4766_v19, %v2556_v26  ;;  %v2576_v7 = vmax.f32 %v2574_v31, %v2575_v35  ;;  %v2567_v38 = vmax.f32 %v2565_v25, %v2566_v34 }
 0x2cd   : > { %v2683_v12 = vmax.f32 %v2635_v37, 0.0  ;;  %v2577_v43 = vrot.slane %v2576_v7, 4  ;;  %v2568_v27 = vrot.slane %v2567_v38, 1 }
 0x2cf   : > { %v2819_v40 = vrot.slane %v2683_v12, 3  ;;  %v2578_v44 = vmax.f32 %v2576_v7, %v2577_v43  ;;  %v2569_v45 = vmax.f32 %v2567_v38, %v2568_v27 }
 0x2d1   : > { %v2820_v46 = vsel %vm2747_vm7, %v2819_v40, %v2818_v36  ;;  %v2579_v21 = vrot.slane %v2578_v44, 2  ;;  %v2636_v47 = vadd.f32 %v4766_v19, %v2569_v45 }
 0x2d3   : > { %v2580_v48 = vmax.f32 %v2578_v44, %v2579_v21  ;;  %v2684_v49 = vmax.f32 %v2636_v47, 0.0 }
 0x2d5   : > { %v2581_v50 = vrot.slane %v2580_v48, 1  ;;  %v2821_v52 = vrot.slane %v2684_v49, 2 }
 0x2d7   : > { %v2582_v55 = vmax.f32 %v2580_v48, %v2581_v50  ;;  %v2822_v56 = vsel %vm2750_vm8, %v2821_v52, %v2820_v46 }
 0x2d9   : > { %v2637_v39 = vadd.f32 %v4766_v19, %v2582_v55 }
 0x2da   : > { %2843 = sbr.rel (!%p4130_p5) target bundleno = 798 (0x31e), region = 102 }
 0x2db   : > { %v2685_v54 = vmax.f32 %v2637_v39, 0.0 }
 0x2dd   : > { %v2823_v57 = vrot.slane %v2685_v54, 1 }
 0x2df   : > { %v2824_v53 = vsel %vm2753_vm9, %v2823_v57, %v2822_v56 }
 0x2e0   : > { %2836 = vst.msk [vmem:[%s4674_s12 + $0x28] sm:$0xff] %vm1958_vm2, %v2824_v53 }
 0x2e1   : > { %s4998_s26 = smov (!%p2846_p1, %s2845_s26), 6 }
 0x2e2   : > { %s3301_s22 = sshll.u32 %s4998_s26, 7 }
 0x2e3   : > { %p3304_p2 = scmp.eq.s32.totalorder %s3301_s22, 0 }
 0x2e4   : > { %3857 = sdivrem.u32 (!%p3304_p2), %s4998_s26, 6 }
 0x2e5   : > { %2854 = sbr.rel (%p3304_p2) target bundleno = 798 (0x31e), region = 106 }
 0x2ed   : > { %s4923_s20 = spop.drf %3857 }
 0x2ee   : > { %p3305_p5 = scmp.le.s32.totalorder %s4923_s20, 0 }
 0x2ef   : > { %s4981_s15 = smov (!%p3305_p5), %s4917_s10  ;;  %s4982_s24 = smov (!%p3305_p5), %s4674_s12 }
 0x2f0   : > { %3118 = sbr.rel (%p3305_p5) target bundleno = 769 (0x301), region = 249  ;;  %s4932_s25 = smov (!%p3305_p5), 0  }
 0x2f1   : > { %s4934_s17 = smov (!%p3305_p5), 0  }
 0x2f7 LB: >> { %v2928_v19 = vld [vmem:[%s4051_s24] sm:$0xff]  ;;  %v2930_v42 = vld [vmem:[%s4051_s24 + $0x8] sm:$0xff]  ;;  %v2932_v59 = vld [vmem:[%s4051_s24 + $0x10] sm:$0xff]  ;;  %s2940_s8 = sadd.s32 1, %s4055_s25  ;;  %s2922_s17 = sadd.s32 1, %s4059_s17   ;;  %s4059_s17 = sphi %s4934_s17, %s2922_s17   ;;  %s4055_s25 = sphi %s4932_s25, %s4983_s25   ;;  %s4051_s24 = sphi %s4982_s24, %s2945_s24   ;;  %s4047_s15 = sphi %s4981_s15, %s2946_s15  }
 0x2f8   : >> { %2929 = vst [vmem:[%s4047_s15] sm:$0xff] %v2928_v19  ;;  %2931 = vst [vmem:[%s4047_s15 + $0x8] sm:$0xff] %v2930_v42  ;;  %v2934_v33 = vld [vmem:[%s4051_s24 + $0x18] sm:$0xff]  ;;  %v2936_v60 = vld [vmem:[%s4051_s24 + $0x20] sm:$0xff]  ;;  %p2941_p3 = scmp.ge.s32.totalorder %s2940_s8, %s4923_s20  ;;  %p2921_p4 = scmp.ge.s32.totalorder %s2922_s17, %s4923_s20 }
 0x2f9   : >> { %2933 = vst [vmem:[%s4047_s15 + $0x10] sm:$0xff] %v2932_v59  ;;  %v2938_v32 = vld [vmem:[%s4051_s24 + $0x28] sm:$0xff]  ;;  %2935 = vst [vmem:[%s4047_s15 + $0x18] sm:$0xff] %v2934_v33 }
 0x2fa   : >> { %2937 = vst [vmem:[%s4047_s15 + $0x20] sm:$0xff] %v2936_v60  ;;  %2939 = vst [vmem:[%s4047_s15 + $0x28] sm:$0xff] %v2938_v32  ;;  %s5000_s8 = smov (%p2941_p3, %s2940_s8), 0  ;;  %2924 = sbr.rel (!%p2921_p4) target bundleno = 759 (0x2f7), region = 255 }
 0x2fb   : >> { %s2943_s5 = smul.u32 48, %s5000_s8  ;;  %s4983_s25 = smov %s5000_s8 }
 0x2fd   : >> { %s2945_s24 = scalar_lea.vmem %s4674_s12, %s2943_s5 [#allocation3]   ;;  %s2946_s15 = scalar_lea.vmem %s4917_s10, %s2943_s5  }
 0x301 PF: > { %3859 = sdivrem.u32 %s4998_s26, 6 }
 0x302   : > { %s3306_s18 = smul.u32 48, %s4923_s20 }
 0x304   : > { %s2951_s30 = scalar_lea.vmem %s4674_s12, %s3306_s18 [#allocation3]   ;;  %s2953_s21 = scalar_lea.vmem %s4917_s10, %s3306_s18  }
 0x30a   : > { %s3860_s28 = spop.drf %3859 }
 0x30b   : > { %p3308_p6 = scmp.le.s32.totalorder %s3860_s28, 0 }
 0x30c   : > { %s4061_s14 = smov (!%p3308_p6), %s2953_s21   ;;  %s4065_s4 = smov (!%p3308_p6), %s2951_s30  }
 0x30d   : > { %3132 = sbr.rel (%p3308_p6) target bundleno = 798 (0x31e), region = 260  ;;  %s4069_s6 = smov (!%p3308_p6), 0  }
 0x30e   : > { %s4073_s7 = smov (!%p3308_p6), 0  }
 0x314 LB: >> { %v2963_v61 = vld [vmem:[%s4067_s4] sm:$0xff]  ;;  %s2965_s9 = sadd.s32 1, %s4071_s6  ;;  %s2957_s7 = sadd.s32 1, %s4075_s7   ;;  %s4075_s7 = sphi %s4073_s7, %s2957_s7   ;;  %s4071_s6 = sphi %s4069_s6, %s4070_s6   ;;  %s4067_s4 = sphi %s4065_s4, %s2970_s4   ;;  %s4063_s14 = sphi %s4061_s14, %s2971_s14  }
 0x315   : >> { %2964 = vst [vmem:[%s4063_s14] sm:$0xff] %v2963_v61  ;;  %p2966_p7 = scmp.ge.s32.totalorder %s2965_s9, %s3860_s28  ;;  %p2956_p8 = scmp.ge.s32.totalorder %s2957_s7, %s3860_s28 }
 0x317   : >> { %s5002_s9 = smov (%p2966_p7, %s2965_s9), 0  ;;  %2959 = sbr.rel (!%p2956_p8) target bundleno = 788 (0x314), region = 266 }
 0x318   : >> { %s3309_s12 = sshll.u32 %s5002_s9, 3  ;;  %s4070_s6 = smov %s5002_s9  }
 0x319   : >> { %s2970_s4 = scalar_lea.vmem %s2951_s30, %s3309_s12 [#allocation3]   ;;  %s2971_s14 = scalar_lea.vmem %s2953_s21, %s3309_s12  }
 0x31e PF: > { %p10_p9 = scmp.ge.s32.totalorder %s4118_s16, 4   ;;  %s4984_s12 = smov %s3975_s13 }
 0x31f   : > { %s4985_s13 = smov %s4128_s19  ;;  %s4986_s14 = smov %s4118_s16 }
 0x320   :  { %12 = sbr.rel (!%p10_p9) target bundleno = 2 (0x2), region = 277 }

</bundles_post_ra>
